<compile_context>
chip_gen: v7x
topology: tpu7x:2x2x1
jax: 0.10.0
libtpu: 0.0.40
codegen_flags: <defaults>
</compile_context>

<pallas_src>
import functools

import numpy as np
import jax
import jax.numpy as jnp
from jax.experimental import pallas as pl
from jax.experimental.pallas import tpu as pltpu

# ----------------------------------------------------------------------------
# Small, self-consistent configuration (scaled-down version of the original)
# ----------------------------------------------------------------------------
N_EVENTS = 4
N_SAMPLES = 2048            # original: 2**15
N_FRAMES = 16               # original: n_samples // 256
SAMPLERATE = 22050

N_NOISE_FILTERS = 4
NOISE_EXPRESSIVITY = 2
NOISE_FILTER_SAMPLES = 64
NOISE_DEFORMATIONS = 4
INSTR_EXPRESSIVITY = 2
N_RESONANCES = 8            # number of resonance choices (lookup rows)
N_WAVES = 128               # wavetable inner dim (original: 2048)
N_ENVELOPES = 4
N_DECAYS = 4
N_DEFORMATIONS = 4
N_VERBS = 4
ENV_ITEM_SAMPLES = 32       # original: 128
ENV_FULL_SIZE = 512         # original: 8192


# ----------------------------------------------------------------------------
# Pallas kernels
# ----------------------------------------------------------------------------
def _hard_onehot(sel, n):
    """sparse_softmax(normalize=True) selection == hard one-hot at first argmax
    (matches torch.max tie-breaking)."""
    m = jnp.max(sel, axis=-1, keepdims=True)
    iota = jax.lax.broadcasted_iota(jnp.int32, sel.shape, 1)
    cand = jnp.where(sel == m, iota, n)
    first = jnp.min(cand, axis=-1, keepdims=True)
    return (iota == first).astype(jnp.float32)


def _select_kernel(sel_ref, items_ref, out_ref):
    """Lookup.forward: hard one-hot selection, then one MXU matmul with items."""
    sel = sel_ref[...]                                        # (R, N) logits
    onehot = _hard_onehot(sel, sel.shape[-1])                 # (R, N)
    out_ref[...] = jnp.dot(onehot, items_ref[...],
                           preferred_element_type=jnp.float32)


def select_items(selections, items):
    """Pallas Lookup for lane-dense tables. selections: (..., N); items: (N, D)."""
    lead = selections.shape[:-1]
    n = selections.shape[-1]
    d = items.shape[-1]
    sel2 = selections.reshape(-1, n).astype(jnp.float32)
    r = sel2.shape[0]
    out = pl.pallas_call(
        _select_kernel,
        out_shape=jax.ShapeDtypeStruct((r, d), jnp.float32),
        grid=(1,),
        in_specs=[pl.BlockSpec((r, n), lambda i: (0, 0)),
                  pl.BlockSpec((n, d), lambda i: (0, 0))],
        out_specs=pl.BlockSpec((r, d), lambda i: (0, 0)),
    )(sel2, items.astype(jnp.float32))
    return out.reshape(*lead, d)


def select_items_xla(selections, items):
    """Tiny tables (D <= 128): argmax + take in XLA — same hard one-hot semantics,
    avoids a lane-sparse pallas_call whose launch cost exceeds the work."""
    idx = jnp.argmax(selections, axis=-1)
    return jnp.take(items.astype(jnp.float32), idx, axis=0)


def _reso_fused_kernel(sel_ref, items_ref, waves_ref, out_ref):
    """Fused WavetableLookup: onehot-select -> relu -> bf16 matmul with waves.
    Intermediate selection never touches HBM."""
    sel = sel_ref[...]                                        # (R, N) logits
    onehot = _hard_onehot(sel, sel.shape[-1])                 # (R, N)
    selected = jnp.dot(onehot, items_ref[...],
                       preferred_element_type=jnp.float32)    # (R, K)
    x = jnp.maximum(selected, 0.0).astype(jnp.bfloat16)       # relu + bf16 for MXU
    out_ref[...] = jnp.dot(x, waves_ref[...],
                           preferred_element_type=jnp.float32)  # (R, T) f32


def resonance_lookup(selections, reso_items, waves):
    """selections: (..., N); reso_items: (N, K); waves: (K, T) -> (..., T)."""
    lead = selections.shape[:-1]
    n = selections.shape[-1]
    k = reso_items.shape[-1]
    t = waves.shape[-1]
    sel2 = selections.reshape(-1, n).astype(jnp.float32)
    r = sel2.shape[0]
    out = pl.pallas_call(
        _reso_fused_kernel,
        out_shape=jax.ShapeDtypeStruct((r, t), jnp.float32),
        grid=(1,),
        in_specs=[pl.BlockSpec((r, n), lambda i: (0, 0)),
                  pl.BlockSpec((n, k), lambda i: (0, 0)),
                  pl.BlockSpec((k, t), lambda i: (0, 0))],
        out_specs=pl.BlockSpec((r, t), lambda i: (0, 0)),
        compiler_params=pltpu.CompilerParams(dimension_semantics=("arbitrary",)),
    )(sel2, reso_items.astype(jnp.float32), waves.astype(jnp.bfloat16))
    return out.reshape(*lead, t)


def _softmax2(logits):
    m = jnp.max(logits, axis=-1, keepdims=True)
    e = jnp.exp(logits - m)
    return e / jnp.sum(e, axis=-1, keepdims=True)


def _deform_mix_kernel(conv_ref, def_ref, dry_ref, logit_ref, out_ref, *,
                       expressivity, n_events):
    """Fused deform-weighted sum over the expressivity axis + 2-way wet/dry mix.
    conv/def are laid out (X*E, T): the elementwise product fills full 8-sublane
    vregs; the X-reduction is contiguous static slices."""
    prod = conv_ref[...] * def_ref[...]                       # (X*E, T)
    wet = prod[0:n_events, :]
    for k in range(1, expressivity):
        wet = wet + prod[k * n_events:(k + 1) * n_events, :]  # (E, T)
    w = _softmax2(logit_ref[...])                             # (E, 2)
    out_ref[...] = w[:, 0:1] * dry_ref[...] + w[:, 1:2] * wet


def deform_mix(conv, deform, dry, logits):
    """conv, deform: (E, X, T); dry: (E, T); logits: (E, 2) -> (E, T)."""
    e, x, t = conv.shape
    # layout plumbing (XLA side): (E, X, T) -> (X, E, T) -> (X*E, T)
    c2 = jnp.transpose(conv, (1, 0, 2)).reshape(x * e, t).astype(jnp.float32)
    d2 = jnp.transpose(deform, (1, 0, 2)).reshape(x * e, t).astype(jnp.float32)
    kernel = functools.partial(_deform_mix_kernel, expressivity=x, n_events=e)
    return pl.pallas_call(
        kernel,
        out_shape=jax.ShapeDtypeStruct((e, t), jnp.float32),
        grid=(1,),
        in_specs=[pl.BlockSpec((x * e, t), lambda i: (0, 0)),
                  pl.BlockSpec((x * e, t), lambda i: (0, 0)),
                  pl.BlockSpec((e, t), lambda i: (0, 0)),
                  pl.BlockSpec((e, 2), lambda i: (0, 0))],
        out_specs=pl.BlockSpec((e, t), lambda i: (0, 0)),
    )(c2, d2, dry.astype(jnp.float32), logits.astype(jnp.float32))


def _mix2_kernel(a_ref, b_ref, logit_ref, o_ref):
    w = _softmax2(logit_ref[...])                             # (E, 2)
    o_ref[...] = w[:, 0:1] * a_ref[...] + w[:, 1:2] * b_ref[...]


def mix2(a, b, logits):
    """softmax(logits)[0]*a + softmax(logits)[1]*b, per event, single block."""
    e, t = a.shape
    return pl.pallas_call(
        _mix2_kernel,
        out_shape=jax.ShapeDtypeStruct((e, t), jnp.float32),
        grid=(1,),
        in_specs=[pl.BlockSpec((e, t), lambda i: (0, 0)),
                  pl.BlockSpec((e, t), lambda i: (0, 0)),
                  pl.BlockSpec((e, 2), lambda i: (0, 0))],
        out_specs=pl.BlockSpec((e, t), lambda i: (0, 0)),
    )(a.astype(jnp.float32), b.astype(jnp.float32), logits.astype(jnp.float32))


# ----------------------------------------------------------------------------
# JAX glue (reshapes, FFTs, interpolation, parameter setup)
# ----------------------------------------------------------------------------
def interpolate_last_axis(x, desired_size):
    """F.interpolate(mode='linear', align_corners=False) along the last axis."""
    n = x.shape[-1]
    if n == desired_size:
        return x
    scale = n / desired_size
    coords = (jnp.arange(desired_size, dtype=jnp.float32) + 0.5) * scale - 0.5
    coords = jnp.clip(coords, 0.0, n - 1)
    lo = jnp.floor(coords).astype(jnp.int32)
    hi = jnp.minimum(lo + 1, n - 1)
    frac = coords - lo.astype(jnp.float32)
    xlo = jnp.take(x, lo, axis=-1)
    xhi = jnp.take(x, hi, axis=-1)
    return xlo * (1.0 - frac) + xhi * frac


def upsample_with_holes(x, desired_size):
    n = x.shape[-1]
    factor = desired_size // n
    out = jnp.zeros(x.shape[:-1] + (n, factor), x.dtype)
    out = out.at[..., 0].set(x)
    return out.reshape(x.shape[:-1] + (desired_size,))


def fft_convolve(a, b):
    # TODO(synk): no FFT primitive in Pallas TPU; done with jnp.fft (XLA) glue.
    n = a.shape[-1]
    a_p = jnp.concatenate([a, jnp.zeros_like(a)], axis=-1)
    b_p = jnp.concatenate([b, jnp.zeros_like(b)], axis=-1)
    spec = jnp.fft.rfft(a_p, axis=-1) * jnp.fft.rfft(b_p, axis=-1)
    out = jnp.fft.irfft(spec, axis=-1)
    return out[..., :n]


def hamming_window(n):
    i = jnp.arange(n, dtype=jnp.float32)
    return 0.54 - 0.46 * jnp.cos(2.0 * jnp.pi * i / n)   # torch periodic default


def sparse_softmax_onehot(x):
    idx = jnp.argmax(x, axis=-1)
    return jax.nn.one_hot(idx, x.shape[-1], dtype=jnp.float32)


def make_waves(n_samples, f0s, samplerate):
    t = jnp.arange(n_samples, dtype=jnp.float32) / samplerate
    waves = []
    for f0 in f0s:
        f0 = float(f0)
        phase = 2.0 * jnp.pi * f0 * t
        frac = (f0 * t) % 1.0
        sine = jnp.sin(phase)
        saw = 2.0 * frac - 1.0
        square = jnp.sign(sine)
        tri = 2.0 * jnp.abs(saw) - 1.0
        waves.extend([sine, saw, square, tri])
    return jnp.stack(waves, axis=0)                          # (4*len(f0s), n_samples)


def sample_lookup_preprocess(items, key):
    """SampleLookup.preprocess_items (windowed=True, no envelope flattening)."""
    spec = jnp.fft.rfft(items, axis=-1)
    mags = jnp.abs(spec)
    phases = jax.random.uniform(key, spec.shape, jnp.float32, -np.pi, np.pi)
    imag = jnp.cumsum(phases, axis=1)                        # dim=1 == bins axis for 2-D items
    imag = (imag + np.pi) % (2.0 * np.pi) - np.pi
    spec = mags * jnp.exp(1j * imag)
    x = jnp.fft.irfft(spec, axis=-1)
    return x * hamming_window(x.shape[-1])[None, :]


def init_params(key):
    ks = jax.random.split(key, 8)
    uni = lambda k, shape: jax.random.uniform(k, shape, jnp.float32, -0.02, 0.02)
    params = {
        "noise_items": uni(ks[0], (N_NOISE_FILTERS, NOISE_FILTER_SAMPLES)),         # SampleLookup
        "reso_items": uni(ks[1], (N_RESONANCES, N_WAVES)),                          # WavetableLookup
        "decay_items": uni(ks[2], (N_DECAYS, N_FRAMES)),                            # Decays
        "warp_items": uni(ks[3], (N_DEFORMATIONS, INSTR_EXPRESSIVITY * N_FRAMES)),  # Deformations
        "noise_warp_items": uni(ks[4], (NOISE_DEFORMATIONS, NOISE_EXPRESSIVITY * N_FRAMES)),
    }
    # Envelopes custom init: uniform(-1,1) * linspace(1,0)**uniform(50,100)
    e1 = jax.random.uniform(ks[5], (N_ENVELOPES, ENV_ITEM_SAMPLES), jnp.float32, -1.0, 1.0)
    exps = jax.random.uniform(ks[6], (N_ENVELOPES, 1), jnp.float32, 50.0, 100.0)
    ramp = jnp.linspace(1.0, 0.0, ENV_ITEM_SAMPLES)[None, :]
    params["env_items"] = e1 * (ramp ** exps)
    # Fixed reverb impulse responses (synthetic, deterministic — no file I/O)
    noise = jax.random.uniform(ks[7], (N_VERBS, N_SAMPLES), jnp.float32, -1.0, 1.0)
    decay = jnp.exp(-jnp.arange(N_SAMPLES, dtype=jnp.float32) / (N_SAMPLES / 8.0))[None, :]
    params["verb_items"] = noise * decay
    # Fixed wavetable
    f0s = np.linspace(20.0, 4000.0, num=N_WAVES // 4)
    params["waves"] = make_waves(N_SAMPLES, f0s, SAMPLERATE)
    return params


# ----------------------------------------------------------------------------
# OverfitResonanceModel.forward
# ----------------------------------------------------------------------------
def forward(params, inputs, key):
    k_env_noise, k_phase1, k_phase2 = jax.random.split(key, 3)
    E, T = N_EVENTS, N_SAMPLES

    # ---- impulses = Envelopes.forward(envelopes) ----
    env_items = params["env_items"]
    env_items = env_items - jnp.min(env_items)
    env_items = env_items / (jnp.max(env_items) + 0.001)
    impulses = select_items_xla(inputs["envelopes"], env_items)          # (1,E,32)
    impulses = interpolate_last_axis(impulses, ENV_FULL_SIZE)            # (1,E,512)
    impulses = impulses * jax.random.uniform(k_env_noise, impulses.shape,
                                             jnp.float32, -0.02, 0.02)
    impulses = jnp.concatenate(
        [impulses, jnp.zeros(impulses.shape[:-1] + (T - ENV_FULL_SIZE,), jnp.float32)], axis=-1)

    # ---- noise_res = SampleLookup.forward(noise_resonance), zero-padded to T ----
    noise_items_1 = sample_lookup_preprocess(params["noise_items"], k_phase1)
    noise_res = select_items_xla(inputs["noise_resonance"], noise_items_1)  # (1,E,Xn,64)
    noise_res = jnp.concatenate(
        [noise_res, jnp.zeros(noise_res.shape[:-1] + (T - noise_res.shape[-1],), jnp.float32)],
        axis=-1)

    # ---- noise_def = Deformations(noise_warp).forward(noise_deformations) ----
    nd = select_items_xla(inputs["noise_deformations"], params["noise_warp_items"])
    nd = nd.reshape(1, E, NOISE_EXPRESSIVITY, N_FRAMES)
    nd = jax.nn.softmax(nd, axis=-2)
    noise_def = interpolate_last_axis(nd, T)                              # (1,E,Xn,T)

    # ---- noise wet path: fused deform-sum + wet/dry mix (one Pallas call) ----
    noise_wet = fft_convolve(impulses[:, :, None, :], noise_res)          # (1,E,Xn,T)
    impulses = deform_mix(noise_wet.reshape(E, NOISE_EXPRESSIVITY, T),
                          noise_def.reshape(E, NOISE_EXPRESSIVITY, T),
                          impulses.reshape(E, T),
                          inputs["noise_mixes"].reshape(E, 2)).reshape(1, E, T)

    # ---- resonance = WavetableLookup.forward(resonances): fused select+relu+matmul ----
    resonance = resonance_lookup(inputs["resonances"], params["reso_items"],
                                 params["waves"])                          # (1,E,Xi,T)

    # ---- res_filters = SampleLookup.forward(res_filter), pad + convolve ----
    noise_items_2 = sample_lookup_preprocess(params["noise_items"], k_phase2)
    res_filters = select_items_xla(inputs["res_filter"], noise_items_2)   # (1,E,Xn,64)
    res_filters = jnp.concatenate(
        [res_filters,
         jnp.zeros(res_filters.shape[:-1] + (T - res_filters.shape[-1],), jnp.float32)], axis=-1)
    resonance = fft_convolve(resonance, res_filters)

    # ---- deformations = Deformations(warp).forward(deformations) ----
    df = select_items_xla(inputs["deformations"], params["warp_items"])
    df = df.reshape(1, E, INSTR_EXPRESSIVITY, N_FRAMES)
    df = jax.nn.softmax(df, axis=-2)
    deform = interpolate_last_axis(df, T)                                 # (1,E,Xi,T)

    # ---- decays = Decays.forward(decays) ----
    d_items = params["decay_items"]
    d_items = d_items - jnp.min(d_items)
    d_items = d_items / (jnp.max(d_items) + 0.001)
    d_items = 0.5 + d_items * 0.5                                         # base_resonance=0.5
    dec = select_items_xla(inputs["decays"], d_items)                     # (1,E,N_FRAMES)
    dec = jnp.exp(jnp.cumsum(jnp.log(dec + 1e-12), axis=-1))
    dec = interpolate_last_axis(dec, T)                                   # (1,E,T)

    # ---- dry/wet resonant events: fused deform-sum + wet/dry mix ----
    decaying_resonance = resonance * dec[:, :, None, :]
    dry = impulses[:, :, None, :]
    conv = fft_convolve(dry, decaying_resonance)                          # (1,E,Xi,T)
    final = deform_mix(conv.reshape(E, INSTR_EXPRESSIVITY, T),
                       deform.reshape(E, INSTR_EXPRESSIVITY, T),
                       impulses.reshape(E, T),
                       inputs["mixes"].reshape(E, 2)).reshape(1, E, T)

    # ---- reverb (Lookup over full-length IRs: lane-dense Pallas select) ----
    verb = select_items(inputs["room_choice"], params["verb_items"])      # (1,E,T)
    wet = fft_convolve(verb, final)
    final = mix2(wet.reshape(E, T), final.reshape(E, T),
                 inputs["room_mix"].reshape(E, 2)).reshape(1, E, T)

    # ---- amplitude + Dirac scheduling (pre_sparse times) ----
    final = final * jnp.abs(inputs["amplitudes"])                         # (1,E,1) broadcast
    pos = upsample_with_holes(inputs["times"], T)
    scheduled = fft_convolve(final, pos)
    return scheduled


# ----------------------------------------------------------------------------
# Main
# ----------------------------------------------------------------------------
if __name__ == "__main__":
    key = jax.random.PRNGKey(0)
    k_params, k_in, k_fwd = jax.random.split(key, 3)
    params = init_params(k_params)

    ik = jax.random.split(k_in, 13)
    u = lambda k, shape, lo=-0.02, hi=0.02: jax.random.uniform(k, shape, jnp.float32, lo, hi)
    E = N_EVENTS
    inputs = dict(
        noise_resonance=u(ik[0], (1, E, NOISE_EXPRESSIVITY, N_NOISE_FILTERS)),
        noise_deformations=jax.random.uniform(ik[1], (1, E, N_DEFORMATIONS), jnp.float32, 0.0, 1.0),
        noise_mixes=u(ik[2], (1, E, 2)),
        envelopes=u(ik[3], (1, E, N_ENVELOPES)),
        resonances=u(ik[4], (1, E, INSTR_EXPRESSIVITY, N_RESONANCES)),
        res_filter=u(ik[5], (1, E, NOISE_EXPRESSIVITY, N_NOISE_FILTERS)),
        deformations=u(ik[6], (1, E, N_DEFORMATIONS)),
        decays=u(ik[7], (1, E, N_DECAYS)),
        mixes=u(ik[8], (1, E, 2)),
        amplitudes=jax.random.uniform(ik[9], (1, E, 1), jnp.float32, 0.0, 1.0),
        times=sparse_softmax_onehot(u(ik[10], (1, E, N_FRAMES))),         # pre_sparse=True
        room_choice=u(ik[11], (1, E, N_VERBS)),
        room_mix=u(ik[12], (1, E, 2)),
    )

    fwd = jax.jit(forward)
    out = fwd(params, inputs, k_fwd)
    out = jax.block_until_ready(out)
    assert out.shape == (1, N_EVENTS, N_SAMPLES), out.shape
    assert bool(jnp.all(jnp.isfinite(out)))
    print("KERNEL_OK")
</pallas_src>

<mosaic_0001>
module attributes {stable_mosaic.version = 11 : i64} {
  func.func @_select_kernel(%arg0: i32, %arg1: memref<4x4xf32, #tpu.memory_space<vmem>>, %arg2: memref<4x2048xf32, #tpu.memory_space<vmem>>, %arg3: memref<4x2048xf32, #tpu.memory_space<vmem>>) attributes {dimension_semantics = [#tpu.dimension_semantics<arbitrary>], iteration_bounds = array<i64: 1>, scalar_prefetch = 0 : i64, scratch_operands = 0 : i64, tpu.core_type = #tpu.core_type<tc>, window_params = [{pipeline_mode = #tpu.pipeline_mode<synchronous>, transform_indices = @transform_0, window_bounds = array<i64: 4, 4>}, {pipeline_mode = #tpu.pipeline_mode<synchronous>, transform_indices = @transform_1, window_bounds = array<i64: 4, 2048>}, {pipeline_mode = #tpu.pipeline_mode<synchronous>, transform_indices = @transform_2, window_bounds = array<i64: 4, 2048>}]} {
    %c0 = arith.constant 0 : index
    %c0_0 = arith.constant 0 : index
    %0 = vector.load %arg1[%c0, %c0_0] : memref<4x4xf32, #tpu.memory_space<vmem>>, vector<4x4xf32>
    %cst = arith.constant dense<0xFF800000> : vector<4xf32>
    %1 = vector.multi_reduction <maximumf>, %0, %cst [1] : vector<4x4xf32> to vector<4xf32>
    %2 = vector.shape_cast %1 : vector<4xf32> to vector<4x1xf32>
    %3 = tpu.iota {dimensions = array<i32: 1>} : vector<4x4xi32>
    %4 = vector.broadcast %2 : vector<4x1xf32> to vector<4x4xf32>
    %5 = arith.cmpf oeq, %0, %4 : vector<4x4xf32>
    %c4_i32 = arith.constant 4 : i32
    %6 = vector.broadcast %c4_i32 : i32 to vector<4x4xi32>
    %7 = arith.select %5, %3, %6 : vector<4x4xi1>, vector<4x4xi32>
    %cst_1 = arith.constant dense<2147483647> : vector<4xi32>
    %8 = vector.multi_reduction <minsi>, %7, %cst_1 [1] : vector<4x4xi32> to vector<4xi32>
    %9 = vector.shape_cast %8 : vector<4xi32> to vector<4x1xi32>
    %10 = vector.broadcast %9 : vector<4x1xi32> to vector<4x4xi32>
    %11 = arith.cmpi eq, %3, %10 : vector<4x4xi32>
    %12 = arith.extui %11 : vector<4x4xi1> to vector<4x4xi32>
    %13 = arith.sitofp %12 : vector<4x4xi32> to vector<4x4xf32>
    %c0_2 = arith.constant 0 : index
    %c0_3 = arith.constant 0 : index
    %14 = vector.load %arg2[%c0_2, %c0_3] : memref<4x2048xf32, #tpu.memory_space<vmem>>, vector<4x2048xf32>
    %cst_4 = arith.constant dense<0.000000e+00> : vector<4x2048xf32>
    %15 = tpu.matmul %13, %14, %cst_4 {dimension_numbers = #tpu.dot_dimension_numbers<[1], [0], [0], [1], [0, 0, 1, 1], [], []>} : vector<4x4xf32>, vector<4x2048xf32>, vector<4x2048xf32> -> vector<4x2048xf32>
    %c0_5 = arith.constant 0 : index
    %c0_6 = arith.constant 0 : index
    %16 = vector.load %arg3[%c0_5, %c0_6] : memref<4x2048xf32, #tpu.memory_space<vmem>>, vector<4x2048xf32>
    tpu.vector_store %arg3[%c0_5, %c0_6], %15 {strides = array<i32>} : memref<4x2048xf32, #tpu.memory_space<vmem>>, vector<4x2048xf32>,
    return
  }
  func.func @transform_0(%arg0: i32) -> (i32, i32) {
    %c0_i32 = arith.constant 0 : i32
    %c0_i32_0 = arith.constant 0 : i32
    %c0_i32_1 = arith.constant 0 : i32
    return %c0_i32, %c0_i32_0 : i32, i32
  }
  func.func @transform_1(%arg0: i32) -> (i32, i32) {
    %c0_i32 = arith.constant 0 : i32
    %c0_i32_0 = arith.constant 0 : i32
    %c0_i32_1 = arith.constant 0 : i32
    return %c0_i32, %c0_i32_0 : i32, i32
  }
  func.func @transform_2(%arg0: i32) -> (i32, i32) {
    %c0_i32 = arith.constant 0 : i32
    %c0_i32_0 = arith.constant 0 : i32
    %c0_i32_1 = arith.constant 0 : i32
    return %c0_i32, %c0_i32_0 : i32, i32
  }
}

module attributes {stable_mosaic.version = 11 : i64} {
  func.func @_reso_fused_kernel(%arg0: i32, %arg1: memref<8x8xf32, #tpu.memory_space<vmem>>, %arg2: memref<8x128xf32, #tpu.memory_space<vmem>>, %arg3: memref<128x2048xbf16, #tpu.memory_space<vmem>>, %arg4: memref<8x2048xf32, #tpu.memory_space<vmem>>) attributes {dimension_semantics = [#tpu.dimension_semantics<arbitrary>], iteration_bounds = array<i64: 1>, scalar_prefetch = 0 : i64, scratch_operands = 0 : i64, tpu.core_type = #tpu.core_type<tc>, window_params = [{pipeline_mode = #tpu.pipeline_mode<synchronous>, transform_indices = @transform_0, window_bounds = array<i64: 8, 8>}, {pipeline_mode = #tpu.pipeline_mode<synchronous>, transform_indices = @transform_1, window_bounds = array<i64: 8, 128>}, {pipeline_mode = #tpu.pipeline_mode<synchronous>, transform_indices = @transform_2, window_bounds = array<i64: 128, 2048>}, {pipeline_mode = #tpu.pipeline_mode<synchronous>, transform_indices = @transform_3, window_bounds = array<i64: 8, 2048>}]} {
    %c0 = arith.constant 0 : index
    %c0_0 = arith.constant 0 : index
    %0 = vector.load %arg1[%c0, %c0_0] : memref<8x8xf32, #tpu.memory_space<vmem>>, vector<8x8xf32>
    %cst = arith.constant dense<0xFF800000> : vector<8xf32>
    %1 = vector.multi_reduction <maximumf>, %0, %cst [1] : vector<8x8xf32> to vector<8xf32>
    %2 = vector.shape_cast %1 : vector<8xf32> to vector<8x1xf32>
    %3 = tpu.iota {dimensions = array<i32: 1>} : vector<8x8xi32>
    %4 = vector.broadcast %2 : vector<8x1xf32> to vector<8x8xf32>
    %5 = arith.cmpf oeq, %0, %4 : vector<8x8xf32>
    %c8_i32 = arith.constant 8 : i32
    %6 = vector.broadcast %c8_i32 : i32 to vector<8x8xi32>
    %7 = arith.select %5, %3, %6 : vector<8x8xi1>, vector<8x8xi32>
    %cst_1 = arith.constant dense<2147483647> : vector<8xi32>
    %8 = vector.multi_reduction <minsi>, %7, %cst_1 [1] : vector<8x8xi32> to vector<8xi32>
    %9 = vector.shape_cast %8 : vector<8xi32> to vector<8x1xi32>
    %10 = vector.broadcast %9 : vector<8x1xi32> to vector<8x8xi32>
    %11 = arith.cmpi eq, %3, %10 : vector<8x8xi32>
    %12 = arith.extui %11 : vector<8x8xi1> to vector<8x8xi32>
    %13 = arith.sitofp %12 : vector<8x8xi32> to vector<8x8xf32>
    %c0_2 = arith.constant 0 : index
    %c0_3 = arith.constant 0 : index
    %14 = vector.load %arg2[%c0_2, %c0_3] : memref<8x128xf32, #tpu.memory_space<vmem>>, vector<8x128xf32>
    %cst_4 = arith.constant dense<0.000000e+00> : vector<8x128xf32>
    %15 = tpu.matmul %13, %14, %cst_4 {dimension_numbers = #tpu.dot_dimension_numbers<[1], [0], [0], [1], [0, 0, 1, 1], [], []>} : vector<8x8xf32>, vector<8x128xf32>, vector<8x128xf32> -> vector<8x128xf32>
    %cst_5 = arith.constant 0.000000e+00 : f32
    %16 = vector.broadcast %cst_5 : f32 to vector<8x128xf32>
    %17 = arith.maximumf %15, %16 : vector<8x128xf32>
    %18 = arith.truncf %17 : vector<8x128xf32> to vector<8x128xbf16>
    %c0_6 = arith.constant 0 : index
    %c0_7 = arith.constant 0 : index
    %19 = vector.load %arg3[%c0_6, %c0_7] : memref<128x2048xbf16, #tpu.memory_space<vmem>>, vector<128x2048xbf16>
    %cst_8 = arith.constant dense<0.000000e+00> : vector<8x2048xf32>
    %20 = tpu.matmul %18, %19, %cst_8 {dimension_numbers = #tpu.dot_dimension_numbers<[1], [0], [0], [1], [0, 0, 1, 1], [], []>} : vector<8x128xbf16>, vector<128x2048xbf16>, vector<8x2048xf32> -> vector<8x2048xf32>
    %c0_9 = arith.constant 0 : index
    %c0_10 = arith.constant 0 : index
    %21 = vector.load %arg4[%c0_9, %c0_10] : memref<8x2048xf32, #tpu.memory_space<vmem>>, vector<8x2048xf32>
    tpu.vector_store %arg4[%c0_9, %c0_10], %20 {strides = array<i32>} : memref<8x2048xf32, #tpu.memory_space<vmem>>, vector<8x2048xf32>,
    return
  }
  func.func @transform_0(%arg0: i32) -> (i32, i32) {
    %c0_i32 = arith.constant 0 : i32
    %c0_i32_0 = arith.constant 0 : i32
    %c0_i32_1 = arith.constant 0 : i32
    return %c0_i32, %c0_i32_0 : i32, i32
  }
  func.func @transform_1(%arg0: i32) -> (i32, i32) {
    %c0_i32 = arith.constant 0 : i32
    %c0_i32_0 = arith.constant 0 : i32
    %c0_i32_1 = arith.constant 0 : i32
    return %c0_i32, %c0_i32_0 : i32, i32
  }
  func.func @transform_2(%arg0: i32) -> (i32, i32) {
    %c0_i32 = arith.constant 0 : i32
    %c0_i32_0 = arith.constant 0 : i32
    %c0_i32_1 = arith.constant 0 : i32
    return %c0_i32, %c0_i32_0 : i32, i32
  }
  func.func @transform_3(%arg0: i32) -> (i32, i32) {
    %c0_i32 = arith.constant 0 : i32
    %c0_i32_0 = arith.constant 0 : i32
    %c0_i32_1 = arith.constant 0 : i32
    return %c0_i32, %c0_i32_0 : i32, i32
  }
}

module attributes {stable_mosaic.version = 11 : i64} {
  func.func @_deform_mix_kernel(%arg0: i32, %arg1: memref<8x2048xf32, #tpu.memory_space<vmem>>, %arg2: memref<8x2048xf32, #tpu.memory_space<vmem>>, %arg3: memref<4x2048xf32, #tpu.memory_space<vmem>>, %arg4: memref<4x2xf32, #tpu.memory_space<vmem>>, %arg5: memref<4x2048xf32, #tpu.memory_space<vmem>>) attributes {dimension_semantics = [#tpu.dimension_semantics<arbitrary>], iteration_bounds = array<i64: 1>, scalar_prefetch = 0 : i64, scratch_operands = 0 : i64, tpu.core_type = #tpu.core_type<tc>, window_params = [{pipeline_mode = #tpu.pipeline_mode<synchronous>, transform_indices = @transform_0, window_bounds = array<i64: 8, 2048>}, {pipeline_mode = #tpu.pipeline_mode<synchronous>, transform_indices = @transform_1, window_bounds = array<i64: 8, 2048>}, {pipeline_mode = #tpu.pipeline_mode<synchronous>, transform_indices = @transform_2, window_bounds = array<i64: 4, 2048>}, {pipeline_mode = #tpu.pipeline_mode<synchronous>, transform_indices = @transform_3, window_bounds = array<i64: 4, 2>}, {pipeline_mode = #tpu.pipeline_mode<synchronous>, transform_indices = @transform_4, window_bounds = array<i64: 4, 2048>}]} {
    %c0 = arith.constant 0 : index
    %c0_0 = arith.constant 0 : index
    %0 = vector.load %arg1[%c0, %c0_0] : memref<8x2048xf32, #tpu.memory_space<vmem>>, vector<8x2048xf32>
    %c0_1 = arith.constant 0 : index
    %c0_2 = arith.constant 0 : index
    %1 = vector.load %arg2[%c0_1, %c0_2] : memref<8x2048xf32, #tpu.memory_space<vmem>>, vector<8x2048xf32>
    %2 = arith.mulf %0, %1 : vector<8x2048xf32>
    %3 = vector.extract_strided_slice %2 {offsets = [0, 0], sizes = [4, 2048], strides = [1, 1]} : vector<8x2048xf32> to vector<4x2048xf32>
    %4 = vector.extract_strided_slice %2 {offsets = [4, 0], sizes = [4, 2048], strides = [1, 1]} : vector<8x2048xf32> to vector<4x2048xf32>
    %5 = arith.addf %3, %4 : vector<4x2048xf32>
    %c0_3 = arith.constant 0 : index
    %c0_4 = arith.constant 0 : index
    %6 = vector.load %arg4[%c0_3, %c0_4] : memref<4x2xf32, #tpu.memory_space<vmem>>, vector<4x2xf32>
    %cst = arith.constant dense<0xFF800000> : vector<4xf32>
    %7 = vector.multi_reduction <maximumf>, %6, %cst [1] : vector<4x2xf32> to vector<4xf32>
    %8 = vector.shape_cast %7 : vector<4xf32> to vector<4x1xf32>
    %9 = vector.broadcast %8 : vector<4x1xf32> to vector<4x2xf32>
    %10 = arith.subf %6, %9 : vector<4x2xf32>
    %11 = math.exp %10 : vector<4x2xf32>
    %cst_5 = arith.constant dense<0.000000e+00> : vector<4xf32>
    %12 = vector.multi_reduction <add>, %11, %cst_5 [1] : vector<4x2xf32> to vector<4xf32>
    %13 = vector.shape_cast %12 : vector<4xf32> to vector<4x1xf32>
    %14 = vector.broadcast %13 : vector<4x1xf32> to vector<4x2xf32>
    %15 = arith.divf %11, %14 : vector<4x2xf32>
    %16 = vector.extract_strided_slice %15 {offsets = [0, 0], sizes = [4, 1], strides = [1, 1]} : vector<4x2xf32> to vector<4x1xf32>
    %c0_6 = arith.constant 0 : index
    %c0_7 = arith.constant 0 : index
    %17 = vector.load %arg3[%c0_6, %c0_7] : memref<4x2048xf32, #tpu.memory_space<vmem>>, vector<4x2048xf32>
    %18 = vector.broadcast %16 : vector<4x1xf32> to vector<4x2048xf32>
    %19 = arith.mulf %18, %17 : vector<4x2048xf32>
    %20 = vector.extract_strided_slice %15 {offsets = [0, 1], sizes = [4, 1], strides = [1, 1]} : vector<4x2xf32> to vector<4x1xf32>
    %21 = vector.broadcast %20 : vector<4x1xf32> to vector<4x2048xf32>
    %22 = arith.mulf %21, %5 : vector<4x2048xf32>
    %23 = arith.addf %19, %22 : vector<4x2048xf32>
    %c0_8 = arith.constant 0 : index
    %c0_9 = arith.constant 0 : index
    %24 = vector.load %arg5[%c0_8, %c0_9] : memref<4x2048xf32, #tpu.memory_space<vmem>>, vector<4x2048xf32>
    tpu.vector_store %arg5[%c0_8, %c0_9], %23 {strides = array<i32>} : memref<4x2048xf32, #tpu.memory_space<vmem>>, vector<4x2048xf32>,
    return
  }
  func.func @transform_0(%arg0: i32) -> (i32, i32) {
    %c0_i32 = arith.constant 0 : i32
    %c0_i32_0 = arith.constant 0 : i32
    %c0_i32_1 = arith.constant 0 : i32
    return %c0_i32, %c0_i32_0 : i32, i32
  }
  func.func @transform_1(%arg0: i32) -> (i32, i32) {
    %c0_i32 = arith.constant 0 : i32
    %c0_i32_0 = arith.constant 0 : i32
    %c0_i32_1 = arith.constant 0 : i32
    return %c0_i32, %c0_i32_0 : i32, i32
  }
  func.func @transform_2(%arg0: i32) -> (i32, i32) {
    %c0_i32 = arith.constant 0 : i32
    %c0_i32_0 = arith.constant 0 : i32
    %c0_i32_1 = arith.constant 0 : i32
    return %c0_i32, %c0_i32_0 : i32, i32
  }
  func.func @transform_3(%arg0: i32) -> (i32, i32) {
    %c0_i32 = arith.constant 0 : i32
    %c0_i32_0 = arith.constant 0 : i32
    %c0_i32_1 = arith.constant 0 : i32
    return %c0_i32, %c0_i32_0 : i32, i32
  }
  func.func @transform_4(%arg0: i32) -> (i32, i32) {
    %c0_i32 = arith.constant 0 : i32
    %c0_i32_0 = arith.constant 0 : i32
    %c0_i32_1 = arith.constant 0 : i32
    return %c0_i32, %c0_i32_0 : i32, i32
  }
}

module attributes {stable_mosaic.version = 11 : i64} {
  func.func @_mix2_kernel(%arg0: i32, %arg1: memref<4x2048xf32, #tpu.memory_space<vmem>>, %arg2: memref<4x2048xf32, #tpu.memory_space<vmem>>, %arg3: memref<4x2xf32, #tpu.memory_space<vmem>>, %arg4: memref<4x2048xf32, #tpu.memory_space<vmem>>) attributes {dimension_semantics = [#tpu.dimension_semantics<arbitrary>], iteration_bounds = array<i64: 1>, scalar_prefetch = 0 : i64, scratch_operands = 0 : i64, tpu.core_type = #tpu.core_type<tc>, window_params = [{pipeline_mode = #tpu.pipeline_mode<synchronous>, transform_indices = @transform_0, window_bounds = array<i64: 4, 2048>}, {pipeline_mode = #tpu.pipeline_mode<synchronous>, transform_indices = @transform_1, window_bounds = array<i64: 4, 2048>}, {pipeline_mode = #tpu.pipeline_mode<synchronous>, transform_indices = @transform_2, window_bounds = array<i64: 4, 2>}, {pipeline_mode = #tpu.pipeline_mode<synchronous>, transform_indices = @transform_3, window_bounds = array<i64: 4, 2048>}]} {
    %c0 = arith.constant 0 : index
    %c0_0 = arith.constant 0 : index
    %0 = vector.load %arg3[%c0, %c0_0] : memref<4x2xf32, #tpu.memory_space<vmem>>, vector<4x2xf32>
    %cst = arith.constant dense<0xFF800000> : vector<4xf32>
    %1 = vector.multi_reduction <maximumf>, %0, %cst [1] : vector<4x2xf32> to vector<4xf32>
    %2 = vector.shape_cast %1 : vector<4xf32> to vector<4x1xf32>
    %3 = vector.broadcast %2 : vector<4x1xf32> to vector<4x2xf32>
    %4 = arith.subf %0, %3 : vector<4x2xf32>
    %5 = math.exp %4 : vector<4x2xf32>
    %cst_1 = arith.constant dense<0.000000e+00> : vector<4xf32>
    %6 = vector.multi_reduction <add>, %5, %cst_1 [1] : vector<4x2xf32> to vector<4xf32>
    %7 = vector.shape_cast %6 : vector<4xf32> to vector<4x1xf32>
    %8 = vector.broadcast %7 : vector<4x1xf32> to vector<4x2xf32>
    %9 = arith.divf %5, %8 : vector<4x2xf32>
    %10 = vector.extract_strided_slice %9 {offsets = [0, 0], sizes = [4, 1], strides = [1, 1]} : vector<4x2xf32> to vector<4x1xf32>
    %c0_2 = arith.constant 0 : index
    %c0_3 = arith.constant 0 : index
    %11 = vector.load %arg1[%c0_2, %c0_3] : memref<4x2048xf32, #tpu.memory_space<vmem>>, vector<4x2048xf32>
    %12 = vector.broadcast %10 : vector<4x1xf32> to vector<4x2048xf32>
    %13 = arith.mulf %12, %11 : vector<4x2048xf32>
    %14 = vector.extract_strided_slice %9 {offsets = [0, 1], sizes = [4, 1], strides = [1, 1]} : vector<4x2xf32> to vector<4x1xf32>
    %c0_4 = arith.constant 0 : index
    %c0_5 = arith.constant 0 : index
    %15 = vector.load %arg2[%c0_4, %c0_5] : memref<4x2048xf32, #tpu.memory_space<vmem>>, vector<4x2048xf32>
    %16 = vector.broadcast %14 : vector<4x1xf32> to vector<4x2048xf32>
    %17 = arith.mulf %16, %15 : vector<4x2048xf32>
    %18 = arith.addf %13, %17 : vector<4x2048xf32>
    %c0_6 = arith.constant 0 : index
    %c0_7 = arith.constant 0 : index
    %19 = vector.load %arg4[%c0_6, %c0_7] : memref<4x2048xf32, #tpu.memory_space<vmem>>, vector<4x2048xf32>
    tpu.vector_store %arg4[%c0_6, %c0_7], %18 {strides = array<i32>} : memref<4x2048xf32, #tpu.memory_space<vmem>>, vector<4x2048xf32>,
    return
  }
  func.func @transform_0(%arg0: i32) -> (i32, i32) {
    %c0_i32 = arith.constant 0 : i32
    %c0_i32_0 = arith.constant 0 : i32
    %c0_i32_1 = arith.constant 0 : i32
    return %c0_i32, %c0_i32_0 : i32, i32
  }
  func.func @transform_1(%arg0: i32) -> (i32, i32) {
    %c0_i32 = arith.constant 0 : i32
    %c0_i32_0 = arith.constant 0 : i32
    %c0_i32_1 = arith.constant 0 : i32
    return %c0_i32, %c0_i32_0 : i32, i32
  }
  func.func @transform_2(%arg0: i32) -> (i32, i32) {
    %c0_i32 = arith.constant 0 : i32
    %c0_i32_0 = arith.constant 0 : i32
    %c0_i32_1 = arith.constant 0 : i32
    return %c0_i32, %c0_i32_0 : i32, i32
  }
  func.func @transform_3(%arg0: i32) -> (i32, i32) {
    %c0_i32 = arith.constant 0 : i32
    %c0_i32_0 = arith.constant 0 : i32
    %c0_i32_1 = arith.constant 0 : i32
    return %c0_i32, %c0_i32_0 : i32, i32
  }
}

</mosaic_0001>

<bundles_post_ra>
// kernel: forward.7
= control target key start
LH: loop header
LB: loop body
LE: loop exit
PB: predicated region body
PF: predicated region fallthrough
CT: control target
= control target key end

     0   :  { %7 = vsyncpa [#allocation3], 0  ;;  %s911_s0 = inlined_call_operand.hbm [shape: f32[4,4], index: 0, kind: input, shape index: {}]   ;;  %s912_s1 = inlined_call_operand.hbm [shape: f32[4,2048], index: 1, kind: input, shape index: {}]   ;;  %s913_s2 = inlined_call_operand.vmem [shape: f32[4,2048], index: 2, kind: output, shape index: {}]  }
   0x1   :  { %8 = vsyncpa [#allocation5], 0  ;;  %s821_s9 = smov [#allocation2]   ;;  %s822_s11 = smov [#allocation4]  }
   0x2   :  { %s15_s10 = sshll.u32 %s821_s9, 4  ;;  %s25_s12 = sshll.u32 %s822_s11, 4  ;;  %s16_s10 = int_to_ptr.vmem [resolvable:$true] %s15_s10  ;;  %s26_s12 = int_to_ptr.vmem [resolvable:$true] %s25_s12 }
   0x3   :  { %s773_s15 = scalar_lea.hbm %s911_s0, 64 }
   0x4   :  { %p774_p0 = scmp.ne.s32.totalorder %s911_s0, %s773_s15  ;;  %p777_p1 = scmp.lt.u32.totalorder %s773_s15, %s911_s0 }
   0x6   :  { %p779_p2 = pnand %p777_p1, %p774_p0 }
   0x8   :  { %782 = shalt.err (!%p779_p2)
}
   0x9   :  { %s783_s20 = scalar_lea.vmem %s16_s10, 64  ;;  %p788_p4 = scmp.lt.s32.totalorder %s16_s10, %s16_s10 }
   0xa   :  { %p784_p3 = scmp.ne.s32.totalorder %s16_s10, %s783_s20  ;;  %p789_p5 = scmp.lt.s32.totalorder %s783_s20, %s783_s20 }
   0xc   :  { %p790_p6 = por %p789_p5, %p788_p4 }
   0xe   :  { %p791_p7 = pnand %p790_p6, %p784_p3 }
  0x10   :  { %794 = shalt.err (!%p791_p7)
}
  0x11   :  { %18 = dma.hbm_to_vmem [thread:$0]  %s911_s0, 64, %s16_s10, [#allocation3]  }
  0x12   :  { %s795_s25 = scalar_lea.hbm %s912_s1, 1024 }
  0x13   :  { %p796_p8 = scmp.ne.s32.totalorder %s912_s1, %s795_s25  ;;  %p799_p9 = scmp.lt.u32.totalorder %s795_s25, %s912_s1 }
  0x15   :  { %p801_p10 = pnand %p799_p9, %p796_p8 }
  0x17   :  { %804 = shalt.err (!%p801_p10)
}
  0x18   :  { %s805_s30 = scalar_lea.vmem %s26_s12, 1024  ;;  %p810_p12 = scmp.lt.s32.totalorder %s26_s12, %s26_s12 }
  0x19   :  { %p806_p11 = scmp.ne.s32.totalorder %s26_s12, %s805_s30  ;;  %p811_p13 = scmp.lt.s32.totalorder %s805_s30, %s805_s30 }
  0x1b   :  { %p812_p0 = por %p811_p13, %p810_p12 }
  0x1d   :  { %p813_p1 = pnand %p812_p0, %p806_p11 }
  0x1f   :  { %816 = shalt.err (!%p813_p1)
}
  0x20   :  { %28 = dma.hbm_to_vmem [thread:$0]  %s912_s1, 1024, %s26_s12, [#allocation5]  }
  0x21   :  { %817 = dma.done.wait [#allocation3], 64  }
  0x22   :  { %818 = vsyncadd [#allocation3], 4294967232 }
  0x23   :  { %819 = dma.done.wait [#allocation5], 1024  }
  0x24   :  { %820 = vsyncadd [#allocation5], 4294966272  ;;  %vm36_vm0 = vcmask 27648   ;;  %v35_v0 = vld [vmem:[#allocation2] sm:$0xf]  ;;  %v40_v2 = vlaneseq  ;;  %v823_v9 = vmov 0.0  }
  0x25   :  { %v37_v1 = vsel %vm36_vm0, %v35_v0, -inf  ;;  %187 = vmatprep.mubr.f32.mxu0 %v823_v9  ;;  %258 = vmatprep.mubr.f32.mxu1 %v823_v9  ;;  %v62_v14 = vld [vmem:[#allocation4] sm:$0xff]  ;;  %v63_v15 = vld [vmem:[#allocation4 + $0x8] sm:$0xff]  ;;  %vm90_vm3 = vcmask 1043456   ;;  %v64_v18 = vld [vmem:[#allocation4 + $0x10] sm:$0xff]  ;;  %vm86_vm4 = vcmask 31744  }
  0x26   :  { %38 = vmax.xlane.f32.xlu0 %v37_v1  ;;  %v41_v3 = vand.u32 127, %v40_v2  ;;  %v78_v16 = vcombine.high %v62_v14, %v62_v14  ;;  %v79_v17 = vcombine.high %v63_v15, %v63_v15  ;;  %v65_v19 = vld [vmem:[#allocation4 + $0x18] sm:$0xff]  ;;  %v80_v20 = vcombine.high %v64_v18, %v64_v18  ;;  %v66_v27 = vld [vmem:[#allocation4 + $0x20] sm:$0xff]  ;;  %v67_v28 = vld [vmem:[#allocation4 + $0x28] sm:$0xff] }
  0x27   :  { %v81_v21 = vcombine.high %v65_v19, %v65_v19  ;;  %v82_v30 = vcombine.high %v66_v27, %v66_v27  ;;  %v83_v31 = vcombine.high %v67_v28, %v67_v28  ;;  %v68_v32 = vld [vmem:[#allocation4 + $0x30] sm:$0xff]  ;;  %v69_v33 = vld [vmem:[#allocation4 + $0x38] sm:$0xff] }
  0x28   :  { %738 = vmatprep.subr.msk.mxu0 %vm90_vm3, %v78_v16  ;;  %741 = vmatprep.subr.msk.mxu1 %vm90_vm3, %v79_v17  ;;  %v84_v34 = vcombine.high %v68_v32, %v68_v32  ;;  %v85_v35 = vcombine.high %v69_v33, %v69_v33 }
  0x29   :  { %739 = vmatpush1.msk.msra.mxu0 %vm90_vm3, %v62_v14  ;;  %742 = vmatpush1.msk.msra.mxu1 %vm90_vm3, %v63_v15 }
  0x2a   :  { %744 = vmatprep.subr.msk.mxu0 %vm90_vm3, %v80_v20  ;;  %747 = vmatprep.subr.msk.mxu1 %vm90_vm3, %v81_v21 }
  0xb3   :  { %v39_v4 = vpop.xlane.xlu0 %38 }
  0xb4   :  { %vm42_vm1 = vcmp.eq.f32.partialorder %v35_v0, %v39_v4 }
  0xb5   :  { %v43_v5 = vsel %vm42_vm1, %v41_v3, 4 }
  0xb6   :  { %v44_v6 = vsel %vm36_vm0, %v43_v5, 2147483647 }
  0xb7   :  { %v46_v7 = vshra.s32 %v44_v6, 16  ;;  %v45_v10 = vand.u32 65535, %v44_v6 }
  0xb9   :  { %v48_v8 = vcvt.s32.f32 %v46_v7  ;;  %v47_v12 = vcvt.s32.f32 %v45_v10 }
  0xbb   :  { %49 = vmin.xlane.f32.xlu0 %v48_v8 }
 0x148   :  { %v50_v11 = vpop.xlane.xlu0 %49 }
 0x149   :  { %vm51_vm2 = vcmp.eq.f32.partialorder %v48_v8, %v50_v11  ;;  %v56_v22 = vcvt.f32.s32 %v50_v11 }
 0x14a   :  { %v52_v13 = vsel %vm51_vm2, %v47_v12, inf }
 0x14b   :  { %53 = vmin.xlane.f32.xlu1 %v52_v13  ;;  %v57_v24 = vshll.u32 %v56_v22, 16 }
 0x1d8   :  { %v54_v23 = vpop.xlane.xlu1 %53 }
 0x1d9   :  { %v55_v25 = vcvt.f32.s32 %v54_v23 }
 0x1db   :  { %v58_v26 = vadd.s32 %v57_v24, %v55_v25 }
 0x1dd   :  { %vm59_vm5 = vcmp.eq.s32.totalorder %v41_v3, %v58_v26 }
 0x1de   :  { %v737_v29 = vsel %vm59_vm5, 1.0, %v823_v9 }
 0x1df   :  { %740 = vmatmul.mubr.msk.f32.vlgmr.msra.gmra.mrb[0].mxu0 %vm86_vm4, %v737_v29  ;;  %743 = vmatmul.mubr.msk.f32.vlgmr.msra.gmra.mrb[0].mxu1 %vm86_vm4, %v737_v29 }
 0x1e0   :  { %745 = vmatpush1.msk.msra.mxu0 %vm90_vm3, %v64_v18  ;;  %748 = vmatpush1.msk.msra.mxu1 %vm90_vm3, %v65_v19 }
 0x1e1   :  { %329 = vmatprep.mubr.f32.mxu0 %v823_v9  ;;  %400 = vmatprep.mubr.f32.mxu1 %v823_v9 }
 0x1e2   :  { %750 = vmatprep.subr.msk.mxu0 %vm90_vm3, %v82_v30  ;;  %753 = vmatprep.subr.msk.mxu1 %vm90_vm3, %v83_v31 }
 0x1e3   :  { %746 = vmatmul.mubr.msk.f32.vlgmr.msra.gmra.mrb[2].mxu0 %vm86_vm4, %v737_v29  ;;  %749 = vmatmul.mubr.msk.f32.vlgmr.msra.gmra.mrb[2].mxu1 %vm86_vm4, %v737_v29 }
 0x1e4   :  { %751 = vmatpush1.msk.msra.mxu0 %vm90_vm3, %v66_v27  ;;  %754 = vmatpush1.msk.msra.mxu1 %vm90_vm3, %v67_v28 }
 0x1e5   :  { %471 = vmatprep.mubr.f32.mxu0 %v823_v9  ;;  %542 = vmatprep.mubr.f32.mxu1 %v823_v9 }
 0x1e6   :  { %756 = vmatprep.subr.msk.mxu0 %vm90_vm3, %v84_v34  ;;  %759 = vmatprep.subr.msk.mxu1 %vm90_vm3, %v85_v35 }
 0x1e7   :  { %752 = vmatmul.mubr.msk.f32.vlgmr.msra.gmra.mrb[4].mxu0 %vm86_vm4, %v737_v29  ;;  %755 = vmatmul.mubr.msk.f32.vlgmr.msra.gmra.mrb[4].mxu1 %vm86_vm4, %v737_v29 }
 0x1e8   :  { %757 = vmatpush1.msk.msra.mxu0 %vm90_vm3, %v68_v32  ;;  %760 = vmatpush1.msk.msra.mxu1 %vm90_vm3, %v69_v33 }
 0x1e9   :  { %613 = vmatprep.mubr.f32.mxu0 %v823_v9  ;;  %684 = vmatprep.mubr.f32.mxu1 %v823_v9 }
 0x1eb   :  { %758 = vmatmul.mubr.msk.f32.vlgmr.msra.gmra.mrb[6].mxu0 %vm86_vm4, %v737_v29  ;;  %761 = vmatmul.mubr.msk.f32.vlgmr.msra.gmra.mrb[6].mxu1 %vm86_vm4, %v737_v29 }
 0x2b2   :  { %v189_v36 = vpop.f32.mrb[0].mxu0  ;;  %v260_v37 = vpop.f32.mrb[0].mxu1 }
 0x2b3   :  { %v191_v38 = vpop.f32.mrb[1].mxu0  ;;  %v262_v39 = vpop.f32.mrb[1].mxu1 }
 0x2b4   :  { %v707_v40 = vcombine.low %v189_v36, %v191_v38  ;;  %v708_v41 = vcombine.low %v260_v37, %v262_v39 }
 0x2b6   :  { %723 = vst [vmem:[%s913_s2] sm:$0xff] %v707_v40  ;;  %724 = vst [vmem:[%s913_s2 + $0x8] sm:$0xff] %v708_v41  ;;  %v331_v42 = vpop.f32.mrb[2].mxu0  ;;  %v402_v43 = vpop.f32.mrb[2].mxu1 }
 0x2b7   :  { %v333_v44 = vpop.f32.mrb[3].mxu0  ;;  %v404_v45 = vpop.f32.mrb[3].mxu1 }
 0x2b8   :  { %v709_v46 = vcombine.low %v331_v42, %v333_v44  ;;  %v710_v47 = vcombine.low %v402_v43, %v404_v45 }
 0x2ba   :  { %725 = vst [vmem:[%s913_s2 + $0x10] sm:$0xff] %v709_v46  ;;  %726 = vst [vmem:[%s913_s2 + $0x18] sm:$0xff] %v710_v47  ;;  %v473_v48 = vpop.f32.mrb[4].mxu0  ;;  %v544_v49 = vpop.f32.mrb[4].mxu1 }
 0x2bb   :  { %v475_v50 = vpop.f32.mrb[5].mxu0  ;;  %v546_v51 = vpop.f32.mrb[5].mxu1 }
 0x2bc   :  { %v711_v52 = vcombine.low %v473_v48, %v475_v50  ;;  %v712_v53 = vcombine.low %v544_v49, %v546_v51 }
 0x2be   :  { %727 = vst [vmem:[%s913_s2 + $0x20] sm:$0xff] %v711_v52  ;;  %728 = vst [vmem:[%s913_s2 + $0x28] sm:$0xff] %v712_v53  ;;  %v615_v54 = vpop.f32.mrb[6].mxu0  ;;  %v686_v55 = vpop.f32.mrb[6].mxu1 }
 0x2bf   :  { %v617_v56 = vpop.f32.mrb[7].mxu0  ;;  %v688_v57 = vpop.f32.mrb[7].mxu1 }
 0x2c0   :  { %v713_v58 = vcombine.low %v615_v54, %v617_v56  ;;  %v714_v59 = vcombine.low %v686_v55, %v688_v57 }
 0x2c2   :  { %729 = vst [vmem:[%s913_s2 + $0x30] sm:$0xff] %v713_v58  ;;  %730 = vst [vmem:[%s913_s2 + $0x38] sm:$0xff] %v714_v59 }
 0x2c3   :  { %735 = vsyncpa [#allocation3], 1 }
 0x2c4   :  { %736 = vsyncpa [#allocation5], 1 }

// kernel: reverse.15
= control target key start
LH: loop header
LB: loop body
LE: loop exit
PB: predicated region body
PF: predicated region fallthrough
CT: control target
= control target key end

     0   :  { %v2_v0 = vlaneseq  ;;  %s105_s0 = inlined_call_operand.vmem [shape: f32[4,31], index: 0, kind: input, shape index: {}]   ;;  %s106_s1 = inlined_call_operand.vmem [shape: f32[4,31], index: 1, kind: output, shape index: {}]  }
   0x2   :  { %v3_v1 = vsub.s32 30, %v2_v0 }
   0x4   :  { %4 = vset.pattern.permute.xlu0 %v3_v1 }
   0x5   :  { %v20_v2 = vld [vmem:[%s105_s0] sm:$0xf] }
   0x6   :  { %21 = vst [vmem:[#allocation1] sm:$0xf] %v20_v2 }
   0xd   :  { %v38_v3 = vld [vmem:[#allocation1] sm:$0xf] }
   0xe   :  { %39 = vst [vmem:[#allocation0] sm:$0xf] %v38_v3 }
  0x15   :  { %v40_v4 = vld [vmem:[#allocation0] sm:$0xff] }
  0x16   :  { %41 = vperm.xlu0 %4, %v40_v4  }
  0x95   :  { %v42_v5 = vpop.permute.xlu0 %41 }
  0x96   :  { %43 = vst [vmem:[#allocation2] sm:$0xff] %v42_v5 }
  0x9d   :  { %v47_v6 = vld [vmem:[#allocation2] sm:$0xf] }
  0x9e   :  { %49 = vst [vmem:[#allocation3] sm:$0xf] %v47_v6 }
  0xa5   :  { %v65_v7 = vld [vmem:[#allocation3] sm:$0xf] }
  0xa6   :  { %66 = vst [vmem:[%s106_s1] sm:$0xf] %v65_v7 }

// kernel: forward.9
= control target key start
LH: loop header
LB: loop body
LE: loop exit
PB: predicated region body
PF: predicated region fallthrough
CT: control target
= control target key end

     0   :  { %vm16_vm0 = vcmask 64512   ;;  %v20_v2 = vlaneseq  ;;  %v1374_v13 = vmov 0.0   ;;  %vm1375_vm3 = vmmov 0   ;;  %s1863_s0 = inlined_call_operand.vmem [shape: f32[8,8], index: 0, kind: input, shape index: {}]   ;;  %s1864_s1 = inlined_call_operand.vmem [shape: f32[8,128], index: 1, kind: input, shape index: {}]   ;;  %s1865_s2 = inlined_call_operand.vmem [shape: bf16[128,2048], index: 2, kind: input, shape index: {}]   ;;  %s1866_s3 = inlined_call_operand.vmem [shape: f32[8,2048], index: 3, kind: output, shape index: {}]  }
   0x1   :  { %v15_v0 = vld [vmem:[%s1863_s0] sm:$0xff]  ;;  %1366 = vmatprep.subr.mxu0 %v1374_v13  ;;  %1368 = vmatprep.mubr.msk.f32.mxu0 %vm1375_vm3, %v1374_v13  ;;  %v119_v17 = vld [vmem:[%s1865_s2 + $0x8] sm:$0xff] }
   0x2   :  { %v17_v1 = vsel %vm16_vm0, %v15_v0, -inf  ;;  %v1401_v3 = vand.u32 127, %v20_v2  ;;  %v42_v14 = vld [vmem:[%s1864_s1] sm:$0xff]  ;;  %v127_v19 = vld [vmem:[%s1865_s2 + $0x48] sm:$0xff] }
   0x3   :  { %18 = vmax.xlane.f32.xlu0 %v17_v1  ;;  %1367 = vmatpush3.msra.mxu0 %v42_v14  ;;  %v118_v15 = vld [vmem:[%s1865_s2] sm:$0xff]  ;;  %v1238_v23 = vcombine.low %v119_v17, %v127_v19  ;;  %v1239_v24 = vcombine.high %v119_v17, %v127_v19  ;;  %v135_v51 = vld [vmem:[%s1865_s2 + $0x88] sm:$0xff] }
   0x4   :  { %v126_v16 = vld [vmem:[%s1865_s2 + $0x40] sm:$0xff]  ;;  %v143_v52 = vld [vmem:[%s1865_s2 + $0xc8] sm:$0xff] }
   0x5   :  { %v1237_v18 = vcombine.high %v118_v15, %v126_v16  ;;  %v1236_v20 = vcombine.low %v118_v15, %v126_v16  ;;  %v134_v21 = vld [vmem:[%s1865_s2 + $0x80] sm:$0xff]  ;;  %927 = vmatprep.subr.bf16.mxu0 %v1239_v24  ;;  %v1255_v54 = vcombine.high %v135_v51, %v143_v52  ;;  %v151_v56 = vld [vmem:[%s1865_s2 + $0x108] sm:$0xff]  ;;  %v1254_v58 = vcombine.low %v135_v51, %v143_v52  ;;  %v177_v51 = vld [vmem:[%s1865_s2 + $0x1d8] sm:$0xff] }
   0x6   :  { %v142_v22 = vld [vmem:[%s1865_s2 + $0xc0] sm:$0xff]  ;;  %v159_v57 = vld [vmem:[%s1865_s2 + $0x148] sm:$0xff] }
   0x7   :  { %v1253_v25 = vcombine.high %v134_v21, %v142_v22  ;;  %886 = vmatprep.subr.bf16.mxu1 %v1237_v18  ;;  %v1252_v26 = vcombine.low %v134_v21, %v142_v22  ;;  %v150_v27 = vld [vmem:[%s1865_s2 + $0x100] sm:$0xff]  ;;  %v1271_v59 = vcombine.high %v151_v56, %v159_v57  ;;  %v167_v60 = vld [vmem:[%s1865_s2 + $0x188] sm:$0xff]  ;;  %v1270_v62 = vcombine.low %v151_v56, %v159_v57  ;;  %v120_v21 = vld [vmem:[%s1865_s2 + $0x10] sm:$0xff] }
   0x8   :  { %887 = vmatpush1.bf16.msra.mxu1 %v1236_v20  ;;  %v158_v28 = vld [vmem:[%s1865_s2 + $0x140] sm:$0xff]  ;;  %v175_v61 = vld [vmem:[%s1865_s2 + $0x1c8] sm:$0xff]  ;;  %v128_v22 = vld [vmem:[%s1865_s2 + $0x50] sm:$0xff] }
   0x9   :  { %888 = vmatprep.subr.bf16.mxu1 %v1253_v25  ;;  %v1269_v29 = vcombine.high %v150_v27, %v158_v28  ;;  %v1268_v30 = vcombine.low %v150_v27, %v158_v28  ;;  %v166_v31 = vld [vmem:[%s1865_s2 + $0x180] sm:$0xff]  ;;  %v1287_v63 = vcombine.high %v167_v60, %v175_v61  ;;  %v191_v1 = vld [vmem:[%s1865_s2 + $0x248] sm:$0xff]  ;;  %v1286_v2 = vcombine.low %v167_v60, %v175_v61  ;;  %v129_v25 = vld [vmem:[%s1865_s2 + $0x58] sm:$0xff] }
   0xa   :  { %v174_v32 = vld [vmem:[%s1865_s2 + $0x1c0] sm:$0xff]  ;;  %v231_v15 = vld [vmem:[%s1865_s2 + $0x388] sm:$0xff]  ;;  %v1241_v24 = vcombine.high %v120_v21, %v128_v22  ;;  %v184_v56 = vld [vmem:[%s1865_s2 + $0x210] sm:$0xff] }
   0xb   :  { %v1285_v33 = vcombine.high %v166_v31, %v174_v32  ;;  %v1284_v34 = vcombine.low %v166_v31, %v174_v32  ;;  %v182_v35 = vld [vmem:[%s1865_s2 + $0x200] sm:$0xff]  ;;  %v239_v17 = vld [vmem:[%s1865_s2 + $0x3c8] sm:$0xff]  ;;  %v144_v32 = vld [vmem:[%s1865_s2 + $0xd0] sm:$0xff] }
   0xc   :  { %889 = vmatpush1.bf16.msra.mxu1 %v1252_v26  ;;  %v190_v36 = vld [vmem:[%s1865_s2 + $0x240] sm:$0xff]  ;;  %v1350_v18 = vcombine.low %v231_v15, %v239_v17  ;;  %v1351_v19 = vcombine.high %v231_v15, %v239_v17  ;;  %v1240_v26 = vcombine.low %v120_v21, %v128_v22  ;;  %v192_v57 = vld [vmem:[%s1865_s2 + $0x250] sm:$0xff] }
   0xd   :  { %890 = vmatprep.subr.bf16.mxu1 %v1269_v29  ;;  %v1301_v37 = vcombine.high %v182_v35, %v190_v36  ;;  %v1300_v38 = vcombine.low %v182_v35, %v190_v36  ;;  %v198_v39 = vld [vmem:[%s1865_s2 + $0x280] sm:$0xff]  ;;  %v1376_v29 = vmov 0   ;;  %v240_v17 = vld [vmem:[%s1865_s2 + $0x3d0] sm:$0xff] }
   0xe   :  { %v206_v40 = vld [vmem:[%s1865_s2 + $0x2c0] sm:$0xff]  ;;  %918 = vmatprep.mubr.bf16.mxu1 %v1376_v29 }
   0xf   :  { %v1317_v41 = vcombine.high %v198_v39, %v206_v40  ;;  %v1316_v42 = vcombine.low %v198_v39, %v206_v40  ;;  %v214_v43 = vld [vmem:[%s1865_s2 + $0x300] sm:$0xff]  ;;  %v152_v40 = vld [vmem:[%s1865_s2 + $0x110] sm:$0xff] }
  0x10   :  { %891 = vmatpush1.bf16.msra.mxu1 %v1268_v30  ;;  %v222_v44 = vld [vmem:[%s1865_s2 + $0x340] sm:$0xff]  ;;  %v136_v30 = vld [vmem:[%s1865_s2 + $0x90] sm:$0xff] }
  0x11   :  { %892 = vmatprep.subr.bf16.mxu1 %v1285_v33  ;;  %v1333_v45 = vcombine.high %v214_v43, %v222_v44  ;;  %v1332_v46 = vcombine.low %v214_v43, %v222_v44  ;;  %v238_v14 = vld [vmem:[%s1865_s2 + $0x3c0] sm:$0xff]  ;;  %v137_v33 = vld [vmem:[%s1865_s2 + $0x98] sm:$0xff]  ;;  %v1256_v44 = vcombine.low %v136_v30, %v144_v32 }
  0x12   :  { %v161_v43 = vld [vmem:[%s1865_s2 + $0x158] sm:$0xff] }
  0x14   :  { %893 = vmatpush1.bf16.msra.mxu1 %v1284_v34  ;;  %v145_v34 = vld [vmem:[%s1865_s2 + $0xd8] sm:$0xff] }
  0x15   :  { %894 = vmatprep.subr.bf16.mxu1 %v1301_v37  ;;  %v1259_v39 = vcombine.high %v137_v33, %v145_v34 }
  0x18   :  { %895 = vmatpush1.bf16.msra.mxu1 %v1300_v38  ;;  %v1257_v38 = vcombine.high %v136_v30, %v144_v32 }
  0x19   :  { %896 = vmatprep.subr.bf16.mxu1 %v1317_v41  ;;  %v160_v41 = vld [vmem:[%s1865_s2 + $0x150] sm:$0xff] }
  0x1a   :  { %v1272_v52 = vcombine.low %v152_v40, %v160_v41 }
  0x1c   :  { %897 = vmatpush1.bf16.msra.mxu1 %v1316_v42  ;;  %v153_v42 = vld [vmem:[%s1865_s2 + $0x118] sm:$0xff] }
  0x1d   :  { %898 = vmatprep.subr.bf16.mxu1 %v1333_v45  ;;  %v1258_v45 = vcombine.low %v137_v33, %v145_v34  ;;  %v138_v33 = vld [vmem:[%s1865_s2 + $0xa0] sm:$0xff] }
  0x1e   :  { %v146_v34 = vld [vmem:[%s1865_s2 + $0xe0] sm:$0xff] }
  0x20   :  { %899 = vmatpush1.bf16.msra.mxu1 %v1332_v46  ;;  %v1273_v46 = vcombine.high %v152_v40, %v160_v41  ;;  %v1261_v40 = vcombine.high %v138_v33, %v146_v34 }
  0x90   :  { %v19_v4 = vpop.xlane.xlu0 %18 }
  0x91   :  { %vm22_vm1 = vcmp.eq.f32.partialorder %v15_v0, %v19_v4  ;;  %v183_v0 = vld [vmem:[%s1865_s2 + $0x208] sm:$0xff] }
  0x92   :  { %v23_v5 = vsel %vm22_vm1, %v1401_v3, 8  ;;  %v199_v4 = vld [vmem:[%s1865_s2 + $0x288] sm:$0xff] }
  0x93   :  { %v24_v6 = vsel %vm16_vm0, %v23_v5, 2147483647  ;;  %v207_v5 = vld [vmem:[%s1865_s2 + $0x2c8] sm:$0xff] }
  0x94   :  { %v26_v7 = vshra.s32 %v24_v6, 16  ;;  %v25_v9 = vand.u32 65535, %v24_v6  ;;  %v1302_v6 = vcombine.low %v183_v0, %v191_v1 }
  0x96   :  { %v28_v8 = vcvt.s32.f32 %v26_v7  ;;  %v27_v11 = vcvt.s32.f32 %v25_v9  ;;  %v1319_v7 = vcombine.high %v199_v4, %v207_v5  ;;  %v223_v9 = vld [vmem:[%s1865_s2 + $0x348] sm:$0xff] }
  0x98   :  { %29 = vmin.xlane.f32.xlu0 %v28_v8 }
 0x125   :  { %v30_v10 = vpop.xlane.xlu0 %29 }
 0x126   :  { %vm31_vm2 = vcmp.eq.f32.partialorder %v28_v8, %v30_v10  ;;  %v36_v47 = vcvt.f32.s32 %v30_v10  ;;  %v215_v8 = vld [vmem:[%s1865_s2 + $0x308] sm:$0xff]  ;;  %v1318_v10 = vcombine.low %v199_v4, %v207_v5  ;;  %v1304_v4 = vcombine.low %v184_v56, %v192_v57 }
 0x127   :  { %v32_v12 = vsel %vm31_vm2, %v27_v11, inf  ;;  %v1335_v11 = vcombine.high %v215_v8, %v223_v9 }
 0x128   :  { %33 = vmin.xlane.f32.xlu1 %v32_v12  ;;  %v37_v49 = vshll.u32 %v36_v47, 16  ;;  %v1334_v12 = vcombine.low %v215_v8, %v223_v9  ;;  %v1275_v47 = vcombine.high %v153_v42, %v161_v43  ;;  %v216_v8 = vld [vmem:[%s1865_s2 + $0x310] sm:$0xff] }
 0x129   :  { %v224_v9 = vld [vmem:[%s1865_s2 + $0x350] sm:$0xff] }
 0x1b5   :  { %v34_v48 = vpop.xlane.xlu1 %33 }
 0x1b6   :  { %v35_v50 = vcvt.f32.s32 %v34_v48  ;;  %v168_v48 = vld [vmem:[%s1865_s2 + $0x190] sm:$0xff] }
 0x1b8   :  { %v38_v53 = vadd.s32 %v37_v49, %v35_v50  ;;  %v176_v49 = vld [vmem:[%s1865_s2 + $0x1d0] sm:$0xff]  ;;  %v169_v50 = vld [vmem:[%s1865_s2 + $0x198] sm:$0xff] }
 0x1b9   :  { %v1288_v60 = vcombine.low %v168_v48, %v176_v49  ;;  %v1290_v61 = vcombine.low %v169_v50, %v177_v51 }
 0x1ba   :  { %vm39_vm4 = vcmp.eq.s32.totalorder %v1401_v3, %v38_v53  ;;  %v1303_v3 = vcombine.high %v183_v0, %v191_v1  ;;  %v1274_v53 = vcombine.low %v153_v42, %v161_v43  ;;  %v200_v0 = vld [vmem:[%s1865_s2 + $0x290] sm:$0xff]  ;;  %v154_v42 = vld [vmem:[%s1865_s2 + $0x120] sm:$0xff] }
 0x1bb   :  { %v1234_v55 = vsel %vm39_vm4, 1.0, %v1374_v13  ;;  %v230_v13 = vld [vmem:[%s1865_s2 + $0x380] sm:$0xff]  ;;  %v208_v1 = vld [vmem:[%s1865_s2 + $0x2d0] sm:$0xff] }
 0x1bc   :  { %1369 = vmatmul.mubr.msk.f32.vlgmr.msra.gmra.mrb[0].mxu0 %vm16_vm0, %v1234_v55  ;;  %v1349_v16 = vcombine.high %v230_v13, %v238_v14  ;;  %v1348_v20 = vcombine.low %v230_v13, %v238_v14  ;;  %v1291_v55 = vcombine.high %v169_v50, %v177_v51  ;;  %v1337_v14 = vcombine.high %v216_v8, %v224_v9  ;;  %v162_v43 = vld [vmem:[%s1865_s2 + $0x160] sm:$0xff] }
 0x1bd   :  { %928 = vmatpush1.bf16.msra.mxu0 %v1238_v23  ;;  %v121_v23 = vld [vmem:[%s1865_s2 + $0x18] sm:$0xff]  ;;  %959 = vmatprep.mubr.bf16.mxu0 %v1376_v29  ;;  %v170_v50 = vld [vmem:[%s1865_s2 + $0x1a0] sm:$0xff] }
 0x1be   :  { %929 = vmatprep.subr.bf16.mxu0 %v1255_v54  ;;  %900 = vmatprep.subr.bf16.mxu1 %v1349_v16  ;;  %v1242_v27 = vcombine.low %v121_v23, %v129_v25  ;;  %v1243_v28 = vcombine.high %v121_v23, %v129_v25  ;;  %v1289_v54 = vcombine.high %v168_v48, %v176_v49  ;;  %v232_v16 = vld [vmem:[%s1865_s2 + $0x390] sm:$0xff]  ;;  %v130_v25 = vld [vmem:[%s1865_s2 + $0x60] sm:$0xff] }
 0x1bf   :  { %901 = vmatpush1.bf16.msra.mxu1 %v1348_v20  ;;  %v1336_v20 = vcombine.low %v216_v8, %v224_v9  ;;  %v1353_v22 = vcombine.high %v232_v16, %v240_v17  ;;  %v1277_v48 = vcombine.high %v154_v42, %v162_v43  ;;  %v178_v51 = vld [vmem:[%s1865_s2 + $0x1e0] sm:$0xff] }
 0x1c0   :  { %968 = vmatprep.subr.bf16.mxu1 %v1241_v24  ;;  %v122_v24 = vld [vmem:[%s1865_s2 + $0x20] sm:$0xff] }
 0x1c1   :  { %930 = vmatpush1.bf16.msra.mxu0 %v1254_v58  ;;  %v185_v58 = vld [vmem:[%s1865_s2 + $0x218] sm:$0xff] }
 0x1c2   :  { %931 = vmatprep.subr.bf16.mxu0 %v1271_v59  ;;  %v193_v59 = vld [vmem:[%s1865_s2 + $0x258] sm:$0xff] }
 0x1c3   :  { %v1306_v5 = vcombine.low %v185_v58, %v193_v59 }
 0x1c5   :  { %932 = vmatpush1.bf16.msra.mxu0 %v1270_v62  ;;  %v1305_v62 = vcombine.high %v184_v56, %v192_v57  ;;  %v1293_v56 = vcombine.high %v170_v50, %v178_v51 }
 0x1c6   :  { %933 = vmatprep.subr.bf16.mxu0 %v1287_v63  ;;  %v1307_v63 = vcombine.high %v185_v58, %v193_v59  ;;  %v186_v58 = vld [vmem:[%s1865_s2 + $0x220] sm:$0xff] }
 0x1c7   :  { %v194_v59 = vld [vmem:[%s1865_s2 + $0x260] sm:$0xff] }
 0x1c9   :  { %934 = vmatpush1.bf16.msra.mxu0 %v1286_v2  ;;  %v201_v2 = vld [vmem:[%s1865_s2 + $0x298] sm:$0xff] }
 0x1ca   :  { %935 = vmatprep.subr.bf16.mxu0 %v1303_v3  ;;  %v209_v3 = vld [vmem:[%s1865_s2 + $0x2d8] sm:$0xff] }
 0x1cb   :  { %v1322_v13 = vcombine.low %v201_v2, %v209_v3 }
 0x1cd   :  { %936 = vmatpush1.bf16.msra.mxu0 %v1302_v6  ;;  %v1321_v6 = vcombine.high %v200_v0, %v208_v1 }
 0x1ce   :  { %937 = vmatprep.subr.bf16.mxu0 %v1319_v7  ;;  %v1323_v7 = vcombine.high %v201_v2, %v209_v3  ;;  %v202_v2 = vld [vmem:[%s1865_s2 + $0x2a0] sm:$0xff] }
 0x1cf   :  { %v210_v3 = vld [vmem:[%s1865_s2 + $0x2e0] sm:$0xff] }
 0x1d0   :  { %v1325_v8 = vcombine.high %v202_v2, %v210_v3 }
 0x1d1   :  { %938 = vmatpush1.bf16.msra.mxu0 %v1318_v10  ;;  %v217_v10 = vld [vmem:[%s1865_s2 + $0x318] sm:$0xff] }
 0x1d2   :  { %939 = vmatprep.subr.bf16.mxu0 %v1335_v11  ;;  %v225_v11 = vld [vmem:[%s1865_s2 + $0x358] sm:$0xff] }
 0x1d3   :  { %v1339_v15 = vcombine.high %v217_v10, %v225_v11  ;;  %v1338_v21 = vcombine.low %v217_v10, %v225_v11  ;;  %v218_v10 = vld [vmem:[%s1865_s2 + $0x320] sm:$0xff] }
 0x1d4   :  { %v226_v11 = vld [vmem:[%s1865_s2 + $0x360] sm:$0xff] }
 0x1d5   :  { %940 = vmatpush1.bf16.msra.mxu0 %v1334_v12  ;;  %v1320_v12 = vcombine.low %v200_v0, %v208_v1  ;;  %v1309_v0 = vcombine.high %v186_v58, %v194_v59 }
 0x1d6   :  { %941 = vmatprep.subr.bf16.mxu0 %v1351_v19  ;;  %v241_v19 = vld [vmem:[%s1865_s2 + $0x3d8] sm:$0xff] }
 0x1d9   :  { %942 = vmatpush1.bf16.msra.mxu0 %v1350_v18  ;;  %v233_v18 = vld [vmem:[%s1865_s2 + $0x398] sm:$0xff] }
 0x1da   :  { %1009 = vmatprep.subr.bf16.mxu0 %v1243_v28  ;;  %v1355_v23 = vcombine.high %v233_v18, %v241_v19  ;;  %v1352_v28 = vcombine.low %v232_v16, %v240_v17  ;;  %v1354_v30 = vcombine.low %v233_v18, %v241_v19  ;;  %v1341_v16 = vcombine.high %v218_v10, %v226_v11  ;;  %v234_v18 = vld [vmem:[%s1865_s2 + $0x3a0] sm:$0xff] }
 0x1db   :  { %v242_v19 = vld [vmem:[%s1865_s2 + $0x3e0] sm:$0xff] }
 0x28f   :  { %v112_v31 = vpop.f32.mrb[0].mxu0 }
 0x290   :  { %v116_v35 = vmax.f32 %v112_v31, 0.0  ;;  %v1370_v36 = vpop.f32.mrb[1].mxu0  ;;  %v1245_v31 = vcombine.high %v122_v24, %v130_v25 }
 0x291   :  { %v147_v36 = vld [vmem:[%s1865_s2 + $0xe8] sm:$0xff] }
 0x292   :  { %v1535_v37 = vpack.c.bf16 %v116_v35, %v116_v35  ;;  %v139_v35 = vld [vmem:[%s1865_s2 + $0xa8] sm:$0xff] }
 0x293   :  { %v1263_v41 = vcombine.high %v139_v35, %v147_v36 }
 0x294   :  { %919 = vmatmul.mubr.bf16.vlgmr.msra.gmra.mrb[0].mxu1 %v1535_v37  ;;  %960 = vmatmul.mubr.bf16.vlgmr.msra.gmra.mrb[4].mxu0 %v1535_v37 }
 0x295   :  { %969 = vmatpush1.bf16.msra.mxu1 %v1240_v26  ;;  %1010 = vmatpush1.bf16.msra.mxu0 %v1242_v27  ;;  %v123_v26 = vld [vmem:[%s1865_s2 + $0x28] sm:$0xff] }
 0x296   :  { %970 = vmatprep.subr.bf16.mxu1 %v1257_v38  ;;  %1011 = vmatprep.subr.bf16.mxu0 %v1259_v39  ;;  %v131_v27 = vld [vmem:[%s1865_s2 + $0x68] sm:$0xff]  ;;  %v1244_v38 = vcombine.low %v122_v24, %v130_v25  ;;  %v1357_v24 = vcombine.high %v234_v18, %v242_v19 }
 0x297   :  { %1000 = vmatprep.mubr.bf16.mxu1 %v1376_v29  ;;  %1041 = vmatprep.mubr.bf16.mxu0 %v1376_v29  ;;  %v1247_v32 = vcombine.high %v123_v26, %v131_v27  ;;  %v1246_v39 = vcombine.low %v123_v26, %v131_v27  ;;  %v124_v26 = vld [vmem:[%s1865_s2 + $0x30] sm:$0xff] }
 0x298   :  { %v132_v27 = vld [vmem:[%s1865_s2 + $0x70] sm:$0xff] }
 0x299   :  { %971 = vmatpush1.bf16.msra.mxu1 %v1256_v44  ;;  %1012 = vmatpush1.bf16.msra.mxu0 %v1258_v45  ;;  %v155_v44 = vld [vmem:[%s1865_s2 + $0x128] sm:$0xff] }
 0x29a   :  { %972 = vmatprep.subr.bf16.mxu1 %v1273_v46  ;;  %1013 = vmatprep.subr.bf16.mxu0 %v1275_v47  ;;  %v163_v45 = vld [vmem:[%s1865_s2 + $0x168] sm:$0xff]  ;;  %v1260_v46 = vcombine.low %v138_v33, %v146_v34  ;;  %v1262_v47 = vcombine.low %v139_v35, %v147_v36  ;;  %v1249_v33 = vcombine.high %v124_v26, %v132_v27  ;;  %v140_v35 = vld [vmem:[%s1865_s2 + $0xb0] sm:$0xff] }
 0x29b   :  { %v1279_v49 = vcombine.high %v155_v44, %v163_v45  ;;  %v148_v36 = vld [vmem:[%s1865_s2 + $0xf0] sm:$0xff] }
 0x29d   :  { %973 = vmatpush1.bf16.msra.mxu1 %v1272_v52  ;;  %1014 = vmatpush1.bf16.msra.mxu0 %v1274_v53  ;;  %v171_v52 = vld [vmem:[%s1865_s2 + $0x1a8] sm:$0xff] }
 0x29e   :  { %974 = vmatprep.subr.bf16.mxu1 %v1289_v54  ;;  %1015 = vmatprep.subr.bf16.mxu0 %v1291_v55  ;;  %v179_v53 = vld [vmem:[%s1865_s2 + $0x1e8] sm:$0xff]  ;;  %v1276_v54 = vcombine.low %v154_v42, %v162_v43  ;;  %v1278_v55 = vcombine.low %v155_v44, %v163_v45  ;;  %v1265_v42 = vcombine.high %v140_v35, %v148_v36  ;;  %v156_v44 = vld [vmem:[%s1865_s2 + $0x130] sm:$0xff] }
 0x29f   :  { %v1295_v57 = vcombine.high %v171_v52, %v179_v53  ;;  %v164_v45 = vld [vmem:[%s1865_s2 + $0x170] sm:$0xff] }
 0x2a1   :  { %975 = vmatpush1.bf16.msra.mxu1 %v1288_v60  ;;  %1016 = vmatpush1.bf16.msra.mxu0 %v1290_v61  ;;  %v187_v60 = vld [vmem:[%s1865_s2 + $0x228] sm:$0xff] }
 0x2a2   :  { %976 = vmatprep.subr.bf16.mxu1 %v1305_v62  ;;  %1017 = vmatprep.subr.bf16.mxu0 %v1307_v63  ;;  %v195_v61 = vld [vmem:[%s1865_s2 + $0x268] sm:$0xff]  ;;  %v1292_v62 = vcombine.low %v170_v50, %v178_v51  ;;  %v1294_v63 = vcombine.low %v171_v52, %v179_v53  ;;  %v1281_v50 = vcombine.high %v156_v44, %v164_v45  ;;  %v172_v52 = vld [vmem:[%s1865_s2 + $0x1b0] sm:$0xff] }
 0x2a3   :  { %v1311_v1 = vcombine.high %v187_v60, %v195_v61  ;;  %v180_v53 = vld [vmem:[%s1865_s2 + $0x1f0] sm:$0xff] }
 0x2a5   :  { %977 = vmatpush1.bf16.msra.mxu1 %v1304_v4  ;;  %1018 = vmatpush1.bf16.msra.mxu0 %v1306_v5  ;;  %v203_v4 = vld [vmem:[%s1865_s2 + $0x2a8] sm:$0xff] }
 0x2a6   :  { %978 = vmatprep.subr.bf16.mxu1 %v1321_v6  ;;  %1019 = vmatprep.subr.bf16.mxu0 %v1323_v7  ;;  %v211_v5 = vld [vmem:[%s1865_s2 + $0x2e8] sm:$0xff]  ;;  %v1308_v6 = vcombine.low %v186_v58, %v194_v59  ;;  %v1310_v7 = vcombine.low %v187_v60, %v195_v61  ;;  %v1297_v58 = vcombine.high %v172_v52, %v180_v53  ;;  %v188_v60 = vld [vmem:[%s1865_s2 + $0x230] sm:$0xff] }
 0x2a7   :  { %v1327_v9 = vcombine.high %v203_v4, %v211_v5  ;;  %v196_v61 = vld [vmem:[%s1865_s2 + $0x270] sm:$0xff] }
 0x2a9   :  { %979 = vmatpush1.bf16.msra.mxu1 %v1320_v12  ;;  %1020 = vmatpush1.bf16.msra.mxu0 %v1322_v13  ;;  %v219_v12 = vld [vmem:[%s1865_s2 + $0x328] sm:$0xff] }
 0x2aa   :  { %980 = vmatprep.subr.bf16.mxu1 %v1337_v14  ;;  %1021 = vmatprep.subr.bf16.mxu0 %v1339_v15  ;;  %v227_v13 = vld [vmem:[%s1865_s2 + $0x368] sm:$0xff]  ;;  %v1324_v14 = vcombine.low %v202_v2, %v210_v3  ;;  %v1326_v15 = vcombine.low %v203_v4, %v211_v5  ;;  %v204_v3 = vld [vmem:[%s1865_s2 + $0x2b0] sm:$0xff]  ;;  %v205_v5 = vld [vmem:[%s1865_s2 + $0x2b8] sm:$0xff] }
 0x2ab   :  { %v1343_v17 = vcombine.high %v219_v12, %v227_v13  ;;  %v212_v4 = vld [vmem:[%s1865_s2 + $0x2f0] sm:$0xff] }
 0x2ad   :  { %981 = vmatpush1.bf16.msra.mxu1 %v1336_v20  ;;  %1022 = vmatpush1.bf16.msra.mxu0 %v1338_v21  ;;  %v235_v20 = vld [vmem:[%s1865_s2 + $0x3a8] sm:$0xff] }
 0x2ae   :  { %982 = vmatprep.subr.bf16.mxu1 %v1353_v22  ;;  %1023 = vmatprep.subr.bf16.mxu0 %v1355_v23  ;;  %v243_v21 = vld [vmem:[%s1865_s2 + $0x3e8] sm:$0xff]  ;;  %v1340_v22 = vcombine.low %v218_v10, %v226_v11  ;;  %v1342_v23 = vcombine.low %v219_v12, %v227_v13  ;;  %v220_v11 = vld [vmem:[%s1865_s2 + $0x330] sm:$0xff]  ;;  %v221_v13 = vld [vmem:[%s1865_s2 + $0x338] sm:$0xff] }
 0x2af   :  { %v1359_v25 = vcombine.high %v235_v20, %v243_v21  ;;  %v228_v12 = vld [vmem:[%s1865_s2 + $0x370] sm:$0xff] }
 0x2b1   :  { %983 = vmatpush1.bf16.msra.mxu1 %v1352_v28  ;;  %1024 = vmatpush1.bf16.msra.mxu0 %v1354_v30  ;;  %v125_v28 = vld [vmem:[%s1865_s2 + $0x38] sm:$0xff] }
 0x2b2   :  { %1050 = vmatprep.subr.bf16.mxu1 %v1245_v31  ;;  %1091 = vmatprep.subr.bf16.mxu0 %v1247_v32  ;;  %v133_v30 = vld [vmem:[%s1865_s2 + $0x78] sm:$0xff]  ;;  %v1356_v31 = vcombine.low %v234_v18, %v242_v19  ;;  %v1358_v32 = vcombine.low %v235_v20, %v243_v21  ;;  %v236_v19 = vld [vmem:[%s1865_s2 + $0x3b0] sm:$0xff] }
 0x2b3   :  { %v1251_v34 = vcombine.high %v125_v28, %v133_v30  ;;  %v244_v20 = vld [vmem:[%s1865_s2 + $0x3f0] sm:$0xff]  ;;  %v237_v21 = vld [vmem:[%s1865_s2 + $0x3b8] sm:$0xff] }
 0x2b4   :  { %1001 = vmatmul.mubr.bf16.vlgmr.msra.gmra.mrb[4].mxu1 %v1535_v37  ;;  %1042 = vmatmul.mubr.bf16.vlgmr.msra.gmra.mrb[8].mxu0 %v1535_v37 }
 0x2b5   :  { %1051 = vmatpush1.bf16.msra.mxu1 %v1244_v38  ;;  %1092 = vmatpush1.bf16.msra.mxu0 %v1246_v39  ;;  %v141_v38 = vld [vmem:[%s1865_s2 + $0xb8] sm:$0xff] }
 0x2b6   :  { %1052 = vmatprep.subr.bf16.mxu1 %v1261_v40  ;;  %1093 = vmatprep.subr.bf16.mxu0 %v1263_v41  ;;  %v149_v39 = vld [vmem:[%s1865_s2 + $0xf8] sm:$0xff]  ;;  %v1248_v40 = vcombine.low %v124_v26, %v132_v27  ;;  %v1250_v41 = vcombine.low %v125_v28, %v133_v30  ;;  %v1360_v27 = vcombine.low %v236_v19, %v244_v20 }
 0x2b7   :  { %1082 = vmatprep.mubr.bf16.mxu1 %v1376_v29  ;;  %1123 = vmatprep.mubr.bf16.mxu0 %v1376_v29  ;;  %v1267_v43 = vcombine.high %v141_v38, %v149_v39 }
 0x2b9   :  { %1053 = vmatpush1.bf16.msra.mxu1 %v1260_v46  ;;  %1094 = vmatpush1.bf16.msra.mxu0 %v1262_v47  ;;  %v157_v46 = vld [vmem:[%s1865_s2 + $0x138] sm:$0xff] }
 0x2ba   :  { %1054 = vmatprep.subr.bf16.mxu1 %v1277_v48  ;;  %1095 = vmatprep.subr.bf16.mxu0 %v1279_v49  ;;  %v165_v47 = vld [vmem:[%s1865_s2 + $0x178] sm:$0xff]  ;;  %v1264_v48 = vcombine.low %v140_v35, %v148_v36  ;;  %v1266_v49 = vcombine.low %v141_v38, %v149_v39 }
 0x2bb   :  { %v1283_v51 = vcombine.high %v157_v46, %v165_v47 }
 0x2bd   :  { %1055 = vmatpush1.bf16.msra.mxu1 %v1276_v54  ;;  %1096 = vmatpush1.bf16.msra.mxu0 %v1278_v55  ;;  %v173_v54 = vld [vmem:[%s1865_s2 + $0x1b8] sm:$0xff] }
 0x2be   :  { %1056 = vmatprep.subr.bf16.mxu1 %v1293_v56  ;;  %1097 = vmatprep.subr.bf16.mxu0 %v1295_v57  ;;  %v181_v55 = vld [vmem:[%s1865_s2 + $0x1f8] sm:$0xff]  ;;  %v1280_v56 = vcombine.low %v156_v44, %v164_v45  ;;  %v1282_v57 = vcombine.low %v157_v46, %v165_v47 }
 0x2bf   :  { %v1299_v59 = vcombine.high %v173_v54, %v181_v55 }
 0x2c1   :  { %1057 = vmatpush1.bf16.msra.mxu1 %v1292_v62  ;;  %1098 = vmatpush1.bf16.msra.mxu0 %v1294_v63  ;;  %v197_v62 = vld [vmem:[%s1865_s2 + $0x278] sm:$0xff]  ;;  %v1296_v63 = vcombine.low %v172_v52, %v180_v53 }
 0x2c2   :  { %1058 = vmatprep.subr.bf16.mxu1 %v1309_v0  ;;  %1099 = vmatprep.subr.bf16.mxu0 %v1311_v1  ;;  %v1298_v0 = vcombine.low %v173_v54, %v181_v55  ;;  %v1313_v1 = vcombine.high %v188_v60, %v196_v61 }
 0x2c5   :  { %1059 = vmatpush1.bf16.msra.mxu1 %v1308_v6  ;;  %1100 = vmatpush1.bf16.msra.mxu0 %v1310_v7  ;;  %v213_v6 = vld [vmem:[%s1865_s2 + $0x2f8] sm:$0xff]  ;;  %v1312_v7 = vcombine.low %v188_v60, %v196_v61 }
 0x2c6   :  { %1060 = vmatprep.subr.bf16.mxu1 %v1325_v8  ;;  %1101 = vmatprep.subr.bf16.mxu0 %v1327_v9  ;;  %v1329_v9 = vcombine.high %v204_v3, %v212_v4  ;;  %v1331_v10 = vcombine.high %v205_v5, %v213_v6 }
 0x2c9   :  { %1061 = vmatpush1.bf16.msra.mxu1 %v1324_v14  ;;  %1102 = vmatpush1.bf16.msra.mxu0 %v1326_v15  ;;  %v229_v14 = vld [vmem:[%s1865_s2 + $0x378] sm:$0xff]  ;;  %v1328_v15 = vcombine.low %v204_v3, %v212_v4 }
 0x2ca   :  { %1062 = vmatprep.subr.bf16.mxu1 %v1341_v16  ;;  %1103 = vmatprep.subr.bf16.mxu0 %v1343_v17  ;;  %v1330_v16 = vcombine.low %v205_v5, %v213_v6  ;;  %v1345_v17 = vcombine.high %v220_v11, %v228_v12  ;;  %v1347_v18 = vcombine.high %v221_v13, %v229_v14 }
 0x2cd   :  { %1063 = vmatpush1.bf16.msra.mxu1 %v1340_v22  ;;  %1104 = vmatpush1.bf16.msra.mxu0 %v1342_v23  ;;  %v245_v22 = vld [vmem:[%s1865_s2 + $0x3f8] sm:$0xff]  ;;  %v1344_v23 = vcombine.low %v220_v11, %v228_v12 }
 0x2ce   :  { %1064 = vmatprep.subr.bf16.mxu1 %v1357_v24  ;;  %1105 = vmatprep.subr.bf16.mxu0 %v1359_v25  ;;  %v1346_v24 = vcombine.low %v221_v13, %v229_v14  ;;  %v1361_v25 = vcombine.high %v236_v19, %v244_v20  ;;  %v1363_v26 = vcombine.high %v237_v21, %v245_v22 }
 0x2cf   :  { %v1362_v28 = vcombine.low %v237_v21, %v245_v22 }
 0x2d1   :  { %1065 = vmatpush1.bf16.msra.mxu1 %v1356_v31  ;;  %1106 = vmatpush1.bf16.msra.mxu0 %v1358_v32 }
 0x2d2   :  { %1132 = vmatprep.subr.bf16.mxu1 %v1249_v33  ;;  %1173 = vmatprep.subr.bf16.mxu0 %v1251_v34 }
 0x2d4   :  { %1083 = vmatmul.mubr.bf16.vlgmr.msra.gmra.mrb[8].mxu1 %v1535_v37  ;;  %1124 = vmatmul.mubr.bf16.vlgmr.msra.gmra.mrb[12].mxu0 %v1535_v37 }
 0x2d5   :  { %1133 = vmatpush1.bf16.msra.mxu1 %v1248_v40  ;;  %1174 = vmatpush1.bf16.msra.mxu0 %v1250_v41 }
 0x2d6   :  { %1134 = vmatprep.subr.bf16.mxu1 %v1265_v42  ;;  %1175 = vmatprep.subr.bf16.mxu0 %v1267_v43 }
 0x2d7   :  { %1164 = vmatprep.mubr.bf16.mxu1 %v1376_v29  ;;  %1205 = vmatprep.mubr.bf16.mxu0 %v1376_v29  ;;  %v189_v29 = vld [vmem:[%s1865_s2 + $0x238] sm:$0xff] }
 0x2d8   :  { %v1315_v2 = vcombine.high %v189_v29, %v197_v62  ;;  %v1314_v8 = vcombine.low %v189_v29, %v197_v62 }
 0x2d9   :  { %1135 = vmatpush1.bf16.msra.mxu1 %v1264_v48  ;;  %1176 = vmatpush1.bf16.msra.mxu0 %v1266_v49 }
 0x2da   :  { %1136 = vmatprep.subr.bf16.mxu1 %v1281_v50  ;;  %1177 = vmatprep.subr.bf16.mxu0 %v1283_v51 }
 0x2dd   :  { %1137 = vmatpush1.bf16.msra.mxu1 %v1280_v56  ;;  %1178 = vmatpush1.bf16.msra.mxu0 %v1282_v57 }
 0x2de   :  { %1138 = vmatprep.subr.bf16.mxu1 %v1297_v58  ;;  %1179 = vmatprep.subr.bf16.mxu0 %v1299_v59 }
 0x2e1   :  { %1139 = vmatpush1.bf16.msra.mxu1 %v1296_v63  ;;  %1180 = vmatpush1.bf16.msra.mxu0 %v1298_v0 }
 0x2e2   :  { %1140 = vmatprep.subr.bf16.mxu1 %v1313_v1  ;;  %1181 = vmatprep.subr.bf16.mxu0 %v1315_v2 }
 0x2e5   :  { %1141 = vmatpush1.bf16.msra.mxu1 %v1312_v7  ;;  %1182 = vmatpush1.bf16.msra.mxu0 %v1314_v8 }
 0x2e6   :  { %1142 = vmatprep.subr.bf16.mxu1 %v1329_v9  ;;  %1183 = vmatprep.subr.bf16.mxu0 %v1331_v10 }
 0x2e9   :  { %1143 = vmatpush1.bf16.msra.mxu1 %v1328_v15  ;;  %1184 = vmatpush1.bf16.msra.mxu0 %v1330_v16 }
 0x2ea   :  { %1144 = vmatprep.subr.bf16.mxu1 %v1345_v17  ;;  %1185 = vmatprep.subr.bf16.mxu0 %v1347_v18 }
 0x2ed   :  { %1145 = vmatpush1.bf16.msra.mxu1 %v1344_v23  ;;  %1186 = vmatpush1.bf16.msra.mxu0 %v1346_v24 }
 0x2ee   :  { %1146 = vmatprep.subr.bf16.mxu1 %v1361_v25  ;;  %1187 = vmatprep.subr.bf16.mxu0 %v1363_v26 }
 0x2f1   :  { %1147 = vmatpush1.bf16.msra.mxu1 %v1360_v27  ;;  %1188 = vmatpush1.bf16.msra.mxu0 %v1362_v28 }
 0x2f4   :  { %1165 = vmatmul.mubr.bf16.vlgmr.msra.gmra.mrb[12].mxu1 %v1535_v37  ;;  %1206 = vmatmul.mubr.bf16.vlgmr.msra.gmra.mrb[16].mxu0 %v1535_v37 }
 0x367   :  { %v920_v30 = vpop.f32.mrb[0].mxu1  ;;  %v961_v31 = vpop.f32.mrb[4].mxu0 }
 0x368   :  { %1214 = vst [vmem:[%s1866_s3] sm:$0xff] %v920_v30  ;;  %1216 = vst [vmem:[%s1866_s3 + $0x10] sm:$0xff] %v961_v31  ;;  %v922_v32 = vpop.f32.mrb[1].mxu1  ;;  %v963_v33 = vpop.f32.mrb[5].mxu0 }
 0x369   :  { %1215 = vst [vmem:[%s1866_s3 + $0x8] sm:$0xff] %v922_v32  ;;  %1217 = vst [vmem:[%s1866_s3 + $0x18] sm:$0xff] %v963_v33  ;;  %v924_v37 = vpop.f32.mrb[2].mxu1  ;;  %v965_v34 = vpop.f32.mrb[6].mxu0 }
 0x36a   :  { %v925_v35 = vpop.f32.mrb[3].mxu1  ;;  %v966_v36 = vpop.f32.mrb[7].mxu0 }
 0x387   :  { %v1002_v38 = vpop.f32.mrb[4].mxu1  ;;  %v1043_v39 = vpop.f32.mrb[8].mxu0 }
 0x388   :  { %1218 = vst [vmem:[%s1866_s3 + $0x20] sm:$0xff] %v1002_v38  ;;  %1220 = vst [vmem:[%s1866_s3 + $0x30] sm:$0xff] %v1043_v39  ;;  %v1004_v40 = vpop.f32.mrb[5].mxu1  ;;  %v1045_v41 = vpop.f32.mrb[9].mxu0 }
 0x389   :  { %1219 = vst [vmem:[%s1866_s3 + $0x28] sm:$0xff] %v1004_v40  ;;  %1221 = vst [vmem:[%s1866_s3 + $0x38] sm:$0xff] %v1045_v41  ;;  %v1006_v42 = vpop.f32.mrb[6].mxu1  ;;  %v1047_v43 = vpop.f32.mrb[10].mxu0 }
 0x38a   :  { %v1007_v44 = vpop.f32.mrb[7].mxu1  ;;  %v1048_v45 = vpop.f32.mrb[11].mxu0 }
 0x3a7   :  { %v1084_v46 = vpop.f32.mrb[8].mxu1  ;;  %v1125_v47 = vpop.f32.mrb[12].mxu0 }
 0x3a8   :  { %1222 = vst [vmem:[%s1866_s3 + $0x40] sm:$0xff] %v1084_v46  ;;  %1224 = vst [vmem:[%s1866_s3 + $0x50] sm:$0xff] %v1125_v47  ;;  %v1086_v48 = vpop.f32.mrb[9].mxu1  ;;  %v1127_v49 = vpop.f32.mrb[13].mxu0 }
 0x3a9   :  { %1223 = vst [vmem:[%s1866_s3 + $0x48] sm:$0xff] %v1086_v48  ;;  %1225 = vst [vmem:[%s1866_s3 + $0x58] sm:$0xff] %v1127_v49  ;;  %v1088_v50 = vpop.f32.mrb[10].mxu1  ;;  %v1129_v51 = vpop.f32.mrb[14].mxu0 }
 0x3aa   :  { %v1089_v52 = vpop.f32.mrb[11].mxu1  ;;  %v1130_v53 = vpop.f32.mrb[15].mxu0 }
 0x3c7   :  { %v1166_v54 = vpop.f32.mrb[12].mxu1  ;;  %v1207_v55 = vpop.f32.mrb[16].mxu0 }
 0x3c8   :  { %1226 = vst [vmem:[%s1866_s3 + $0x60] sm:$0xff] %v1166_v54  ;;  %1228 = vst [vmem:[%s1866_s3 + $0x70] sm:$0xff] %v1207_v55  ;;  %v1168_v56 = vpop.f32.mrb[13].mxu1  ;;  %v1209_v57 = vpop.f32.mrb[17].mxu0 }
 0x3c9   :  { %1227 = vst [vmem:[%s1866_s3 + $0x68] sm:$0xff] %v1168_v56  ;;  %1229 = vst [vmem:[%s1866_s3 + $0x78] sm:$0xff] %v1209_v57  ;;  %v1170_v58 = vpop.f32.mrb[14].mxu1  ;;  %v1211_v59 = vpop.f32.mrb[18].mxu0 }
 0x3ca   :  { %v1171_v60 = vpop.f32.mrb[15].mxu1  ;;  %v1212_v61 = vpop.f32.mrb[19].mxu0 }

// kernel: reverse.28
= control target key start
LH: loop header
LB: loop body
LE: loop exit
PB: predicated region body
PF: predicated region fallthrough
CT: control target
= control target key end

     0   :  { %v2_v0 = vlaneseq  ;;  %s458_s0 = inlined_call_operand.vmem [shape: f32[1,4,2,2048], index: 0, kind: input, shape index: {}]   ;;  %s459_s1 = inlined_call_operand.vmem [shape: f32[1,4,2,2048], index: 1, kind: output, shape index: {}]  }
   0x2   :  { %v411_v1 = vsub.s32 127, %v2_v0 }
   0x4   :  { %4 = vset.pattern.permute.xlu0 %v411_v1 }
   0x5   :  { %s414_s6 = smov 0   ;;  %s416_s7 = smov 0  }
   0x6   :  { %s418_s8 = smov 0  }
   0x7 LB: > { %s334_s9 = sadd.s32 4294967295, %s399_s8   ;;  %s25_s10 = sadd.s32 1, %s395_s7  ;;  %s399_s8 = sphi %s418_s8, %s10_s8   ;;  %s395_s7 = sphi %s416_s7, %s461_s7   ;;  %s391_s6 = sphi %s414_s6, %s460_s6  }
   0x8   : > { %p26_p0 = scmp.ge.s32.totalorder %s25_s10, 16  ;;  %p336_p1 = scmp.ge.s32.totalorder %s399_s8, 16 }
   0x9   : > { %s52_s11 = sand.u32 (!%p336_p1), 1, %s399_s8   ;;  %s55_s12 = ssub.s32 (!%p336_p1), 15, %s395_s7 }
   0xa   : > { %s463_s10 = smov (%p26_p0, %s25_s10), 0  ;;  %50 = sbr.rel (%p336_p1) target bundleno = 18 (0x12), region = 16 }
   0xb   : > { %s337_s13 = sshll.u32 (!%p336_p1), %s52_s11, 3  ;;  %s338_s14 = sshll.u32 (!%p336_p1), %s55_s12, 1 }
   0xc   : > { %s64_s17 = scalar_lea.vmem (!%p336_p1), %s458_s0, %s338_s14  ;;  %s54_s18 = scalar_lea.vmem (!%p336_p1), [#allocation1], %s337_s13 }
   0xd   : > { %v80_v2 = vld [vmem:[%s64_s17] sm:$0x3] (!%p336_p1) }
   0xe   : > { %v82_v3 = vld [vmem:[%s64_s17 + $0x20] sm:$0x3] (!%p336_p1)  ;;  %81 = vst [vmem:[%s54_s18] sm:$0x3] (!%p336_p1), %v80_v2 }
   0xf   : > { %v84_v4 = vld [vmem:[%s64_s17 + $0x40] sm:$0x3] (!%p336_p1)  ;;  %83 = vst [vmem:[%s54_s18 + $0x2] sm:$0x3] (!%p336_p1), %v82_v3 }
  0x10   : > { %85 = vst [vmem:[%s54_s18 + $0x4] sm:$0x3] (!%p336_p1), %v84_v4  ;;  %v86_v5 = vld [vmem:[%s64_s17 + $0x60] sm:$0x3] (!%p336_p1) }
  0x11   : > { %87 = vst [vmem:[%s54_s18 + $0x6] sm:$0x3] %v86_v5 }
  0x12 PF: > { %p339_p2 = scmp.ge.s32.totalorder %s399_s8, 1  ;;  %p117_p3 = scmp.lt.s32.totalorder %s399_s8, 17 }
  0x14   : > { %p118_p4 = pnand %p339_p2, %p117_p3 }
  0x15   : > { %376 = vset.pattern.permute.xlu1 (!%p118_p4), %v411_v1  ;;  %s442_s19 = sand.u32 (!%p118_p4), 1, %s334_s9   ;;  %s349_s23 = sshll.u32 (!%p118_p4), %s391_s6, 1 }
  0x16   : > { %121 = sbr.rel (%p118_p4) target bundleno = 182 (0xb6), region = 57  ;;  %s340_s20 = sshll.u32 (!%p118_p4), %s442_s19, 3 }
  0x17   : > { %s130_s21 = scalar_lea.vmem (!%p118_p4), [#allocation1], %s340_s20  ;;  %s134_s22 = scalar_lea.vmem (!%p118_p4), [#allocation3], %s340_s20 }
  0x18   : > { %v151_v6 = vld [vmem:[%s130_s21] sm:$0x3] (!%p118_p4)  ;;  %v343_v7 = vld [vmem:[%s130_s21 + $0x4] sm:$0x3] (!%p118_p4)  ;;  %v344_v8 = vld [vmem:[%s130_s21 + $0x2] sm:$0x3] (!%p118_p4)  ;;  %s213_s26 = scalar_lea.vmem (!%p118_p4), %s459_s1, %s349_s23 }
  0x19   : > { %152 = vst [vmem:[#allocation0] sm:$0x3] (!%p118_p4), %v151_v6  ;;  %146 = vst [vmem:[#allocation0 + $0x10] sm:$0x3] (!%p118_p4), %v343_v7  ;;  %v342_v9 = vld [vmem:[%s130_s21 + $0x6] sm:$0x3] (!%p118_p4) }
  0x1a   : > { %150 = vst [vmem:[#allocation0 + $0x8] sm:$0x3] (!%p118_p4), %v344_v8  ;;  %141 = vst [vmem:[#allocation0 + $0x18] sm:$0x3] (!%p118_p4), %v342_v9 }
  0x20   : > { %v156_v10 = vld [vmem:[#allocation0] sm:$0xff]  ;;  %v168_v11 = vld [vmem:[#allocation0 + $0x10] sm:$0xff] }
  0x21   : > { %157 = vperm.xlu0 %4, %v156_v10   ;;  %169 = vperm.xlu1 %376, %v168_v11   ;;  %v162_v12 = vld [vmem:[#allocation0 + $0x8] sm:$0xff]  ;;  %v174_v13 = vld [vmem:[#allocation0 + $0x18] sm:$0xff] }
  0x25   : > { %163 = vperm.xlu0 %4, %v162_v12   ;;  %175 = vperm.xlu1 %376, %v174_v13  }
  0xa0   : > { %v158_v14 = vpop.permute.xlu0 %157  ;;  %v170_v15 = vpop.permute.xlu1 %169 }
  0xa1   : > { %159 = vst [vmem:[#allocation2] sm:$0xff] %v158_v14  ;;  %171 = vst [vmem:[#allocation2 + $0x10] sm:$0xff] %v170_v15 }
  0xa4   : > { %v164_v16 = vpop.permute.xlu0 %163  ;;  %v176_v17 = vpop.permute.xlu1 %175 }
  0xa5   : > { %165 = vst [vmem:[#allocation2 + $0x8] sm:$0xff] %v164_v16  ;;  %177 = vst [vmem:[#allocation2 + $0x18] sm:$0xff] %v176_v17 }
  0xa8   : > { %v181_v18 = vld [vmem:[#allocation2] sm:$0x3]  ;;  %v190_v19 = vld [vmem:[#allocation2 + $0x10] sm:$0x3] }
  0xa9   : > { %183 = vst [vmem:[%s134_s22] sm:$0x3] %v181_v18  ;;  %346 = vst [vmem:[%s134_s22 + $0x4] sm:$0x3] %v190_v19 }
  0xac   : > { %v185_v20 = vld [vmem:[#allocation2 + $0x8] sm:$0x3]  ;;  %v196_v21 = vld [vmem:[#allocation2 + $0x18] sm:$0x3] }
  0xad   : > { %345 = vst [vmem:[%s134_s22 + $0x2] sm:$0x3] %v185_v20  ;;  %347 = vst [vmem:[%s134_s22 + $0x6] sm:$0x3] %v196_v21 }
  0xb0   : > { %v229_v22 = vld [vmem:[%s134_s22] sm:$0x3]  ;;  %v233_v23 = vld [vmem:[%s134_s22 + $0x4] sm:$0x3] }
  0xb1   : > { %230 = vst [vmem:[%s213_s26] sm:$0x3] %v229_v22  ;;  %234 = vst [vmem:[%s213_s26 + $0x40] sm:$0x3] %v233_v23 }
  0xb4   : > { %v231_v24 = vld [vmem:[%s134_s22 + $0x2] sm:$0x3]  ;;  %v235_v25 = vld [vmem:[%s134_s22 + $0x6] sm:$0x3] }
  0xb5   : > { %232 = vst [vmem:[%s213_s26 + $0x20] sm:$0x3] %v231_v24  ;;  %236 = vst [vmem:[%s213_s26 + $0x60] sm:$0x3] %v235_v25 }
  0xb6 PF: > { %s10_s8 = sadd.s32 1, %s399_s8   ;;  %s460_s6 = smov %s395_s7 }
  0xb7   : > { %p7_p5 = scmp.ge.s32.totalorder %s10_s8, 18   ;;  %s461_s7 = smov %s463_s10 }
  0xb9   :  { %9 = sbr.rel (!%p7_p5) target bundleno = 7 (0x7), region = 142 }

// kernel: forward.8
= control target key start
LH: loop header
LB: loop body
LE: loop exit
PB: predicated region body
PF: predicated region fallthrough
CT: control target
= control target key end

     0   :  { %vm130_vm0 = vcmask 11264   ;;  %v292_v7 = vmov 0   ;;  %v293_v8 = vmov 1   ;;  %s490_s3 = inlined_call_operand.vmem [shape: f32[4,2], index: 3, kind: input, shape index: {}]   ;;  %s491_s0 = inlined_call_operand.vmem [shape: f32[8,2048], index: 0, kind: input, shape index: {}]   ;;  %s492_s2 = inlined_call_operand.vmem [shape: f32[4,2048], index: 2, kind: input, shape index: {}]   ;;  %s493_s1 = inlined_call_operand.vmem [shape: f32[8,2048], index: 1, kind: input, shape index: {}]   ;;  %s494_s4 = inlined_call_operand.vmem [shape: f32[4,2048], index: 4, kind: output, shape index: {}]  }
   0x1   :  { %v129_v0 = vld [vmem:[%s490_s3] sm:$0xf]  ;;  %277 = vset.pattern.permute.xlu1 %v292_v7  ;;  %279 = vset.pattern.permute.xlu0 %v293_v8  ;;  %v333_v14 = vld [vmem:[%s492_s2 + $0x8] sm:$0xff]  ;;  %v338_v15 = vld [vmem:[%s492_s2 + $0x10] sm:$0xff] }
   0x2   :  { %v131_v1 = vsel %vm130_vm0, %v129_v0, -inf  ;;  %v17_v12 = vld [vmem:[%s491_s0] sm:$0xff]  ;;  %v18_v16 = vld [vmem:[%s491_s0 + $0x8] sm:$0xff]  ;;  %v19_v17 = vld [vmem:[%s491_s0 + $0x10] sm:$0xff]  ;;  %v164_v46 = vcombine.high %v333_v14, %v333_v14  ;;  %v165_v47 = vcombine.high %v338_v15, %v338_v15 }
   0x3   :  { %132 = vmax.xlane.f32.xlu0 %v131_v1  ;;  %v328_v13 = vld [vmem:[%s492_s2] sm:$0xff]  ;;  %v20_v18 = vld [vmem:[%s491_s0 + $0x18] sm:$0xff]  ;;  %v22_v21 = vld [vmem:[%s491_s0 + $0x28] sm:$0xff] }
   0x4   :  { %v21_v19 = vld [vmem:[%s491_s0 + $0x20] sm:$0xff]  ;;  %v23_v22 = vld [vmem:[%s491_s0 + $0x30] sm:$0xff]  ;;  %v24_v23 = vld [vmem:[%s491_s0 + $0x38] sm:$0xff]  ;;  %v163_v45 = vcombine.high %v328_v13, %v328_v13 }
   0x5   :  { %v33_v20 = vld [vmem:[%s493_s1] sm:$0xff]  ;;  %v34_v25 = vld [vmem:[%s493_s1 + $0x8] sm:$0xff]  ;;  %v35_v26 = vld [vmem:[%s493_s1 + $0x10] sm:$0xff] }
   0x6   :  { %v25_v24 = vld [vmem:[%s491_s0 + $0x40] sm:$0xff]  ;;  %v36_v27 = vld [vmem:[%s493_s1 + $0x18] sm:$0xff]  ;;  %v26_v28 = vld [vmem:[%s491_s0 + $0x48] sm:$0xff]  ;;  %v49_v44 = vmul.f32 %v33_v20, %v17_v12  ;;  %v50_v51 = vmul.f32 %v34_v25, %v18_v16  ;;  %v51_v52 = vmul.f32 %v35_v26, %v19_v17 }
   0x7   :  { %v27_v29 = vld [vmem:[%s491_s0 + $0x50] sm:$0xff]  ;;  %v28_v30 = vld [vmem:[%s491_s0 + $0x58] sm:$0xff]  ;;  %v29_v31 = vld [vmem:[%s491_s0 + $0x60] sm:$0xff]  ;;  %v52_v53 = vmul.f32 %v36_v27, %v20_v18 }
   0x8   :  { %v37_v32 = vld [vmem:[%s493_s1 + $0x20] sm:$0xff]  ;;  %v38_v33 = vld [vmem:[%s493_s1 + $0x28] sm:$0xff]  ;;  %v39_v34 = vld [vmem:[%s493_s1 + $0x30] sm:$0xff] }
   0x9   :  { %v30_v35 = vld [vmem:[%s491_s0 + $0x68] sm:$0xff]  ;;  %v31_v36 = vld [vmem:[%s491_s0 + $0x70] sm:$0xff]  ;;  %v32_v37 = vld [vmem:[%s491_s0 + $0x78] sm:$0xff]  ;;  %v53_v54 = vmul.f32 %v37_v32, %v21_v19  ;;  %v54_v55 = vmul.f32 %v38_v33, %v22_v21  ;;  %v55_v56 = vmul.f32 %v39_v34, %v23_v22 }
   0xa   :  { %v40_v38 = vld [vmem:[%s493_s1 + $0x38] sm:$0xff]  ;;  %v41_v39 = vld [vmem:[%s493_s1 + $0x40] sm:$0xff]  ;;  %v42_v40 = vld [vmem:[%s493_s1 + $0x48] sm:$0xff] }
   0xb   :  { %v43_v41 = vld [vmem:[%s493_s1 + $0x50] sm:$0xff]  ;;  %v44_v42 = vld [vmem:[%s493_s1 + $0x58] sm:$0xff]  ;;  %v45_v43 = vld [vmem:[%s493_s1 + $0x60] sm:$0xff]  ;;  %v56_v57 = vmul.f32 %v40_v38, %v24_v23  ;;  %v57_v58 = vmul.f32 %v41_v39, %v25_v24  ;;  %v58_v59 = vmul.f32 %v42_v40, %v26_v28  ;;  %v86_v7 = vrot.slane %v54_v55, 4 }
   0xc   :  { %v46_v48 = vld [vmem:[%s493_s1 + $0x68] sm:$0xff]  ;;  %v47_v49 = vld [vmem:[%s493_s1 + $0x70] sm:$0xff]  ;;  %v48_v50 = vld [vmem:[%s493_s1 + $0x78] sm:$0xff]  ;;  %v59_v60 = vmul.f32 %v43_v41, %v27_v29  ;;  %v60_v61 = vmul.f32 %v44_v42, %v28_v30  ;;  %v61_v62 = vmul.f32 %v45_v43, %v29_v31 }
   0xd   :  { %v62_v63 = vmul.f32 %v46_v48, %v30_v35  ;;  %v64_v1 = vmul.f32 %v48_v50, %v32_v37  ;;  %v145_v22 = vld [vmem:[%s492_s2 + $0x18] sm:$0xff]  ;;  %v146_v27 = vld [vmem:[%s492_s2 + $0x20] sm:$0xff]  ;;  %v147_v28 = vld [vmem:[%s492_s2 + $0x28] sm:$0xff]  ;;  %v118_v29 = vadd.f32 %v86_v7, %v54_v55 }
   0xe   :  { %v91_v12 = vrot.slane %v59_v60, 4  ;;  %v92_v16 = vrot.slane %v60_v61, 4  ;;  %v93_v17 = vrot.slane %v61_v62, 4  ;;  %v148_v33 = vld [vmem:[%s492_s2 + $0x30] sm:$0xff]  ;;  %v149_v34 = vld [vmem:[%s492_s2 + $0x38] sm:$0xff]  ;;  %v166_v38 = vcombine.high %v145_v22, %v145_v22 }
   0xf   :  { %v94_v18 = vrot.slane %v62_v63, 4  ;;  %v96_v20 = vrot.slane %v64_v1, 4  ;;  %v167_v42 = vcombine.high %v146_v27, %v146_v27  ;;  %v168_v43 = vcombine.high %v147_v28, %v147_v28 }
  0x10   :  { %v124_v37 = vadd.f32 %v92_v16, %v60_v61  ;;  %v125_v40 = vadd.f32 %v93_v17, %v61_v62  ;;  %v170_v50 = vcombine.high %v149_v34, %v149_v34 }
  0x11   :  { %v126_v41 = vadd.f32 %v94_v18, %v62_v63  ;;  %v128_v48 = vadd.f32 %v96_v20, %v64_v1 }
  0x90   :  { %v133_v2 = vpop.xlane.xlu0 %132 }
  0x91   :  { %v134_v3 = vsub.f32 %v129_v0, %v133_v2  ;;  %v63_v0 = vmul.f32 %v47_v49, %v31_v36  ;;  %v81_v2 = vrot.slane %v49_v44, 4  ;;  %v123_v36 = vadd.f32 %v91_v12, %v59_v60 }
  0x92   :  { %v169_v49 = vcombine.high %v148_v33, %v148_v33 }
  0x93   :  { %v135_v4 = vmul.f32 1.442695, %v134_v3  ;;  %v82_v3 = vrot.slane %v50_v51, 4  ;;  %v95_v19 = vrot.slane %v63_v0, 4  ;;  %v113_v21 = vadd.f32 %v81_v2, %v49_v44 }
  0x95   :  { %288 = vpow2.f32 %v135_v4  ;;  %v83_v4 = vrot.slane %v51_v52, 4  ;;  %v114_v23 = vadd.f32 %v82_v3, %v50_v51  ;;  %v127_v44 = vadd.f32 %v95_v19, %v63_v0 }
  0x97   :  { %v115_v24 = vadd.f32 %v83_v4, %v51_v52 }
  0x9f   :  { %v289_v5 = vpop.eup %288 }
  0xa0   :  { %v137_v6 = vsel %vm130_vm0, %v289_v5, 0.0 }
  0xa1   :  { %138 = vadd.xlane.f32.xlu0 %v137_v6  ;;  %v85_v6 = vrot.slane %v53_v54, 4 }
  0xa3   :  { %v117_v26 = vadd.f32 %v85_v6, %v53_v54 }
 0x12e   :  { %v139_v9 = vpop.xlane.xlu0 %138 }
 0x12f   :  { %290 = vrcp.f32 %v139_v9  ;;  %v88_v9 = vrot.slane %v56_v57, 4 }
 0x131   :  { %v120_v31 = vadd.f32 %v88_v9, %v56_v57 }
 0x139   :  { %v291_v10 = vpop.eup %290 }
 0x13a   :  { %v141_v11 = vmul.f32 %v291_v10, %v289_v5  ;;  %v84_v5 = vrot.slane %v52_v53, 4  ;;  %v89_v10 = vrot.slane %v57_v58, 4 }
 0x13c   :  { %152 = vperm.xlu1 %277, %v141_v11   ;;  %v116_v25 = vadd.f32 %v84_v5, %v52_v53  ;;  %v121_v32 = vadd.f32 %v89_v10, %v57_v58 }
 0x140   :  { %278 = vset.pattern.permute.xlu1 %v293_v8  ;;  %v87_v8 = vrot.slane %v55_v56, 4 }
 0x141   :  { %196 = vperm.xlu1 %278, %v141_v11   ;;  %v90_v11 = vrot.slane %v58_v59, 4 }
 0x142   :  { %v119_v30 = vadd.f32 %v87_v8, %v55_v56 }
 0x143   :  { %v122_v35 = vadd.f32 %v90_v11, %v58_v59 }
 0x1bb   :  { %v153_v39 = vpop.permute.xlu1 %152 }
 0x1bc   :  { %v179_v51 = vmul.f32 %v153_v39, %v328_v13  ;;  %v180_v52 = vmul.f32 %v163_v45, %v153_v39  ;;  %v181_v53 = vmul.f32 %v153_v39, %v333_v14  ;;  %v182_v54 = vmul.f32 %v164_v46, %v153_v39 }
 0x1bd   :  { %v183_v55 = vmul.f32 %v153_v39, %v338_v15  ;;  %v184_v56 = vmul.f32 %v165_v47, %v153_v39  ;;  %v185_v57 = vmul.f32 %v153_v39, %v145_v22  ;;  %v186_v58 = vmul.f32 %v166_v38, %v153_v39 }
 0x1be   :  { %v187_v59 = vmul.f32 %v153_v39, %v146_v27  ;;  %v188_v60 = vmul.f32 %v167_v42, %v153_v39  ;;  %v189_v61 = vmul.f32 %v153_v39, %v147_v28  ;;  %v190_v62 = vmul.f32 %v168_v43, %v153_v39 }
 0x1bf   :  { %v191_v45 = vmul.f32 %v153_v39, %v148_v33  ;;  %v192_v63 = vmul.f32 %v169_v49, %v153_v39  ;;  %v193_v0 = vmul.f32 %v153_v39, %v149_v34  ;;  %v194_v1 = vmul.f32 %v170_v50, %v153_v39 }
 0x1c0   :  { %v197_v13 = vpop.permute.xlu1 %196 }
 0x1c1   :  { %v199_v2 = vmul.f32 %v197_v13, %v113_v21  ;;  %v200_v14 = vmul.f32 %v197_v13, %v114_v23  ;;  %v201_v46 = vmul.f32 %v197_v13, %v115_v24  ;;  %v202_v3 = vmul.f32 %v197_v13, %v116_v25 }
 0x1c2   :  { %v203_v4 = vmul.f32 %v197_v13, %v117_v26  ;;  %v204_v5 = vmul.f32 %v197_v13, %v118_v29  ;;  %v205_v6 = vmul.f32 %v197_v13, %v119_v30  ;;  %v206_v15 = vmul.f32 %v197_v13, %v120_v31 }
 0x1c3   :  { %v207_v47 = vmul.f32 %v197_v13, %v121_v32  ;;  %v208_v7 = vmul.f32 %v197_v13, %v122_v35  ;;  %v209_v8 = vmul.f32 %v197_v13, %v123_v36  ;;  %v210_v9 = vmul.f32 %v197_v13, %v124_v37 }
 0x1c4   :  { %v211_v10 = vmul.f32 %v197_v13, %v125_v40  ;;  %v212_v11 = vmul.f32 %v197_v13, %v126_v41  ;;  %v213_v12 = vmul.f32 %v197_v13, %v127_v44  ;;  %v214_v16 = vmul.f32 %v197_v13, %v128_v48 }
 0x1c5   :  { %v215_v17 = vadd.f32 %v199_v2, %v179_v51  ;;  %v216_v18 = vadd.f32 %v200_v14, %v180_v52  ;;  %v217_v19 = vadd.f32 %v201_v46, %v181_v53  ;;  %v218_v20 = vadd.f32 %v202_v3, %v182_v54 }
 0x1c6   :  { %v219_v21 = vadd.f32 %v203_v4, %v183_v55  ;;  %v220_v22 = vadd.f32 %v204_v5, %v184_v56  ;;  %v221_v23 = vadd.f32 %v205_v6, %v185_v57  ;;  %v222_v24 = vadd.f32 %v206_v15, %v186_v58 }
 0x1c7   :  { %v223_v25 = vadd.f32 %v207_v47, %v187_v59  ;;  %v224_v26 = vadd.f32 %v208_v7, %v188_v60  ;;  %v225_v27 = vadd.f32 %v209_v8, %v189_v61  ;;  %v226_v28 = vadd.f32 %v210_v9, %v190_v62 }
 0x1c8   :  { %v227_v29 = vadd.f32 %v211_v10, %v191_v45  ;;  %v228_v30 = vadd.f32 %v212_v11, %v192_v63  ;;  %v229_v31 = vadd.f32 %v213_v12, %v193_v0  ;;  %v230_v32 = vadd.f32 %v214_v16, %v194_v1 }
 0x1c9   :  { %v247_v33 = vcombine.low %v215_v17, %v216_v18  ;;  %v248_v34 = vcombine.low %v217_v19, %v218_v20  ;;  %v249_v35 = vcombine.low %v219_v21, %v220_v22  ;;  %v250_v36 = vcombine.low %v221_v23, %v222_v24 }
 0x1ca   :  { %v251_v37 = vcombine.low %v223_v25, %v224_v26  ;;  %v252_v38 = vcombine.low %v225_v27, %v226_v28  ;;  %v253_v39 = vcombine.low %v227_v29, %v228_v30  ;;  %v254_v40 = vcombine.low %v229_v31, %v230_v32 }
 0x1cb   :  { %263 = vst [vmem:[%s494_s4] sm:$0xff] %v247_v33  ;;  %264 = vst [vmem:[%s494_s4 + $0x8] sm:$0xff] %v248_v34 }
 0x1cc   :  { %265 = vst [vmem:[%s494_s4 + $0x10] sm:$0xff] %v249_v35  ;;  %266 = vst [vmem:[%s494_s4 + $0x18] sm:$0xff] %v250_v36 }
 0x1cd   :  { %267 = vst [vmem:[%s494_s4 + $0x20] sm:$0xff] %v251_v37  ;;  %268 = vst [vmem:[%s494_s4 + $0x28] sm:$0xff] %v252_v38 }
 0x1ce   :  { %269 = vst [vmem:[%s494_s4 + $0x30] sm:$0xff] %v253_v39  ;;  %270 = vst [vmem:[%s494_s4 + $0x38] sm:$0xff] %v254_v40 }

// kernel: reverse.34
= control target key start
LH: loop header
LB: loop body
LE: loop exit
PB: predicated region body
PF: predicated region fallthrough
CT: control target
= control target key end

     0   :  { %v2_v0 = vlaneseq  ;;  %s329_s0 = inlined_call_operand.vmem [shape: f32[1,4,2048], index: 0, kind: input, shape index: {}]   ;;  %s330_s1 = inlined_call_operand.vmem [shape: f32[1,4,2048], index: 1, kind: output, shape index: {}]  }
   0x2   :  { %v3_v1 = vsub.s32 127, %v2_v0 }
   0x4   :  { %4 = vset.pattern.permute.xlu0 %v3_v1 }
   0x5   :  { %s289_s6 = smov 0   ;;  %s291_s7 = smov 0  }
   0x6   :  { %s293_s8 = smov 0  }
   0x7 LB: > { %s219_s9 = sadd.s32 4294967295, %s277_s8   ;;  %s22_s10 = sadd.s32 1, %s273_s7  ;;  %s277_s8 = sphi %s293_s8, %s10_s8   ;;  %s273_s7 = sphi %s291_s7, %s332_s7   ;;  %s269_s6 = sphi %s289_s6, %s331_s6  }
   0x8   : > { %p23_p0 = scmp.ge.s32.totalorder %s22_s10, 16  ;;  %p221_p1 = scmp.ge.s32.totalorder %s277_s8, 16 }
   0x9   : > { %s45_s11 = sand.u32 (!%p221_p1), 1, %s277_s8   ;;  %s48_s12 = ssub.s32 (!%p221_p1), 15, %s273_s7 }
   0xa   : > { %s334_s10 = smov (%p23_p0, %s22_s10), 0  ;;  %43 = sbr.rel (%p221_p1) target bundleno = 17 (0x11), region = 16 }
   0xb   : > { %s222_s13 = sshll.u32 (!%p221_p1), %s45_s11, 2  ;;  %s223_s14 = sshll.u32 (!%p221_p1), %s48_s12, 2 }
   0xc   : > { %s54_s17 = scalar_lea.vmem (!%p221_p1), %s329_s0, %s223_s14  ;;  %s47_s18 = scalar_lea.vmem (!%p221_p1), [#allocation1], %s222_s13 }
   0xd   : > { %v70_v2 = vld [vmem:[%s54_s17] sm:$0xf] (!%p221_p1) }
   0xe   : > { %71 = vst [vmem:[%s47_s18] sm:$0xf] (!%p221_p1), %v70_v2 }
  0x11 PF: > { %p224_p2 = scmp.ge.s32.totalorder %s277_s8, 1  ;;  %p87_p3 = scmp.lt.s32.totalorder %s277_s8, 17 }
  0x13   : > { %p88_p4 = pnand %p224_p2, %p87_p3 }
  0x14   : > { %s98_s19 = sand.u32 (!%p88_p4), 1, %s219_s9   ;;  %s228_s23 = sshll.u32 (!%p88_p4), %s269_s6, 2 }
  0x15   : > { %91 = sbr.rel (%p88_p4) target bundleno = 177 (0xb1), region = 50  ;;  %s225_s20 = sshll.u32 (!%p88_p4), %s98_s19, 2 }
  0x16   : > { %s100_s21 = scalar_lea.vmem (!%p88_p4), [#allocation1], %s225_s20  ;;  %s104_s22 = scalar_lea.vmem (!%p88_p4), [#allocation3], %s225_s20 }
  0x17   : > { %v107_v3 = vld [vmem:[%s100_s21] sm:$0xf] (!%p88_p4)  ;;  %s129_s26 = scalar_lea.vmem (!%p88_p4), %s330_s1, %s228_s23 }
  0x18   : > { %108 = vst [vmem:[#allocation0] sm:$0xf] (!%p88_p4), %v107_v3 }
  0x1f   : > { %v110_v4 = vld [vmem:[#allocation0] sm:$0xff] }
  0x20   : > { %111 = vperm.xlu0 %4, %v110_v4  }
  0x9f   : > { %v112_v5 = vpop.permute.xlu0 %111 }
  0xa0   : > { %113 = vst [vmem:[#allocation2] sm:$0xff] %v112_v5 }
  0xa7   : > { %v117_v6 = vld [vmem:[#allocation2] sm:$0xf] }
  0xa8   : > { %119 = vst [vmem:[%s104_s22] sm:$0xf] %v117_v6 }
  0xaf   : > { %v145_v7 = vld [vmem:[%s104_s22] sm:$0xf] }
  0xb0   : > { %146 = vst [vmem:[%s129_s26] sm:$0xf] %v145_v7 }
  0xb1 PF: > { %s10_s8 = sadd.s32 1, %s277_s8   ;;  %s331_s6 = smov %s273_s7 }
  0xb2   : > { %p7_p5 = scmp.ge.s32.totalorder %s10_s8, 18   ;;  %s332_s7 = smov %s334_s10 }
  0xb4   :  { %9 = sbr.rel (!%p7_p5) target bundleno = 7 (0x7), region = 110 }

// kernel: forward.11
= control target key start
LH: loop header
LB: loop body
LE: loop exit
PB: predicated region body
PF: predicated region fallthrough
CT: control target
= control target key end

     0   :  { %vm15_vm0 = vcmask 11264   ;;  %v217_v7 = vmov 0   ;;  %v218_v8 = vmov 1   ;;  %s314_s2 = inlined_call_operand.vmem [shape: f32[4,2], index: 2, kind: input, shape index: {}]   ;;  %s315_s0 = inlined_call_operand.vmem [shape: f32[4,2048], index: 0, kind: input, shape index: {}]   ;;  %s316_s1 = inlined_call_operand.vmem [shape: f32[4,2048], index: 1, kind: input, shape index: {}]   ;;  %s317_s3 = inlined_call_operand.vmem [shape: f32[4,2048], index: 3, kind: output, shape index: {}]  }
   0x1   :  { %v14_v0 = vld [vmem:[%s314_s2] sm:$0xf]  ;;  %194 = vset.pattern.permute.xlu1 %v217_v7  ;;  %196 = vset.pattern.permute.xlu0 %v218_v8  ;;  %v28_v13 = vld [vmem:[%s315_s0 + $0x8] sm:$0xff]  ;;  %v29_v14 = vld [vmem:[%s315_s0 + $0x10] sm:$0xff] }
   0x2   :  { %v16_v1 = vsel %vm15_vm0, %v14_v0, -inf  ;;  %v27_v12 = vld [vmem:[%s315_s0] sm:$0xff]  ;;  %v30_v15 = vld [vmem:[%s315_s0 + $0x18] sm:$0xff]  ;;  %v32_v17 = vld [vmem:[%s315_s0 + $0x28] sm:$0xff]  ;;  %v49_v26 = vcombine.high %v28_v13, %v28_v13  ;;  %v50_v27 = vcombine.high %v29_v14, %v29_v14 }
   0x3   :  { %17 = vmax.xlane.f32.xlu0 %v16_v1  ;;  %v31_v16 = vld [vmem:[%s315_s0 + $0x20] sm:$0xff]  ;;  %v33_v18 = vld [vmem:[%s315_s0 + $0x30] sm:$0xff]  ;;  %v34_v19 = vld [vmem:[%s315_s0 + $0x38] sm:$0xff]  ;;  %v48_v25 = vcombine.high %v27_v12, %v27_v12  ;;  %v51_v28 = vcombine.high %v30_v15, %v30_v15  ;;  %v53_v33 = vcombine.high %v32_v17, %v32_v17 }
   0x4   :  { %v80_v20 = vld [vmem:[%s316_s1] sm:$0xff]  ;;  %v81_v21 = vld [vmem:[%s316_s1 + $0x8] sm:$0xff]  ;;  %v82_v22 = vld [vmem:[%s316_s1 + $0x10] sm:$0xff]  ;;  %v52_v32 = vcombine.high %v31_v16, %v31_v16  ;;  %v54_v34 = vcombine.high %v33_v18, %v33_v18  ;;  %v55_v35 = vcombine.high %v34_v19, %v34_v19 }
   0x5   :  { %v83_v23 = vld [vmem:[%s316_s1 + $0x18] sm:$0xff]  ;;  %v84_v24 = vld [vmem:[%s316_s1 + $0x20] sm:$0xff]  ;;  %v85_v29 = vld [vmem:[%s316_s1 + $0x28] sm:$0xff]  ;;  %v100_v37 = vcombine.high %v80_v20, %v80_v20  ;;  %v101_v38 = vcombine.high %v81_v21, %v81_v21  ;;  %v102_v39 = vcombine.high %v82_v22, %v82_v22 }
   0x6   :  { %v86_v30 = vld [vmem:[%s316_s1 + $0x30] sm:$0xff]  ;;  %v87_v31 = vld [vmem:[%s316_s1 + $0x38] sm:$0xff]  ;;  %v103_v40 = vcombine.high %v83_v23, %v83_v23  ;;  %v104_v41 = vcombine.high %v84_v24, %v84_v24  ;;  %v105_v42 = vcombine.high %v85_v29, %v85_v29 }
   0x7   :  { %v106_v43 = vcombine.high %v86_v30, %v86_v30  ;;  %v107_v44 = vcombine.high %v87_v31, %v87_v31 }
  0x90   :  { %v18_v2 = vpop.xlane.xlu0 %17 }
  0x91   :  { %v19_v3 = vsub.f32 %v14_v0, %v18_v2 }
  0x93   :  { %v20_v4 = vmul.f32 1.442695, %v19_v3 }
  0x95   :  { %213 = vpow2.f32 %v20_v4 }
  0x9f   :  { %v214_v5 = vpop.eup %213 }
  0xa0   :  { %v22_v6 = vsel %vm15_vm0, %v214_v5, 0.0 }
  0xa1   :  { %23 = vadd.xlane.f32.xlu0 %v22_v6 }
 0x12e   :  { %v24_v9 = vpop.xlane.xlu0 %23 }
 0x12f   :  { %215 = vrcp.f32 %v24_v9 }
 0x139   :  { %v216_v10 = vpop.eup %215 }
 0x13a   :  { %v26_v11 = vmul.f32 %v216_v10, %v214_v5 }
 0x13c   :  { %37 = vperm.xlu1 %194, %v26_v11  }
 0x140   :  { %195 = vset.pattern.permute.xlu1 %v218_v8 }
 0x141   :  { %89 = vperm.xlu1 %195, %v26_v11  }
 0x1bb   :  { %v38_v36 = vpop.permute.xlu1 %37 }
 0x1bc   :  { %v64_v45 = vmul.f32 %v38_v36, %v27_v12  ;;  %v65_v46 = vmul.f32 %v48_v25, %v38_v36  ;;  %v66_v47 = vmul.f32 %v38_v36, %v28_v13  ;;  %v67_v48 = vmul.f32 %v49_v26, %v38_v36 }
 0x1bd   :  { %v68_v49 = vmul.f32 %v38_v36, %v29_v14  ;;  %v69_v50 = vmul.f32 %v50_v27, %v38_v36  ;;  %v70_v51 = vmul.f32 %v38_v36, %v30_v15  ;;  %v71_v52 = vmul.f32 %v51_v28, %v38_v36 }
 0x1be   :  { %v72_v53 = vmul.f32 %v38_v36, %v31_v16  ;;  %v73_v54 = vmul.f32 %v52_v32, %v38_v36  ;;  %v74_v55 = vmul.f32 %v38_v36, %v32_v17  ;;  %v75_v56 = vmul.f32 %v53_v33, %v38_v36 }
 0x1bf   :  { %v76_v58 = vmul.f32 %v38_v36, %v33_v18  ;;  %v77_v59 = vmul.f32 %v54_v34, %v38_v36  ;;  %v78_v60 = vmul.f32 %v38_v36, %v34_v19  ;;  %v79_v61 = vmul.f32 %v55_v35, %v38_v36 }
 0x1c0   :  { %v90_v57 = vpop.permute.xlu1 %89 }
 0x1c1   :  { %v116_v62 = vmul.f32 %v90_v57, %v80_v20  ;;  %v117_v63 = vmul.f32 %v100_v37, %v90_v57  ;;  %v118_v0 = vmul.f32 %v90_v57, %v81_v21  ;;  %v119_v1 = vmul.f32 %v101_v38, %v90_v57 }
 0x1c2   :  { %v120_v2 = vmul.f32 %v90_v57, %v82_v22  ;;  %v121_v3 = vmul.f32 %v102_v39, %v90_v57  ;;  %v122_v4 = vmul.f32 %v90_v57, %v83_v23  ;;  %v123_v5 = vmul.f32 %v103_v40, %v90_v57 }
 0x1c3   :  { %v124_v6 = vmul.f32 %v90_v57, %v84_v24  ;;  %v125_v7 = vmul.f32 %v104_v41, %v90_v57  ;;  %v126_v8 = vmul.f32 %v90_v57, %v85_v29  ;;  %v127_v9 = vmul.f32 %v105_v42, %v90_v57 }
 0x1c4   :  { %v128_v10 = vmul.f32 %v90_v57, %v86_v30  ;;  %v129_v11 = vmul.f32 %v106_v43, %v90_v57  ;;  %v130_v12 = vmul.f32 %v90_v57, %v87_v31  ;;  %v131_v13 = vmul.f32 %v107_v44, %v90_v57 }
 0x1c5   :  { %v132_v14 = vadd.f32 %v116_v62, %v64_v45  ;;  %v133_v15 = vadd.f32 %v117_v63, %v65_v46  ;;  %v134_v16 = vadd.f32 %v118_v0, %v66_v47  ;;  %v135_v17 = vadd.f32 %v119_v1, %v67_v48 }
 0x1c6   :  { %v136_v18 = vadd.f32 %v120_v2, %v68_v49  ;;  %v137_v19 = vadd.f32 %v121_v3, %v69_v50  ;;  %v138_v20 = vadd.f32 %v122_v4, %v70_v51  ;;  %v139_v21 = vadd.f32 %v123_v5, %v71_v52 }
 0x1c7   :  { %v140_v22 = vadd.f32 %v124_v6, %v72_v53  ;;  %v141_v25 = vadd.f32 %v125_v7, %v73_v54  ;;  %v142_v23 = vadd.f32 %v126_v8, %v74_v55  ;;  %v143_v26 = vadd.f32 %v127_v9, %v75_v56 }
 0x1c8   :  { %v144_v24 = vadd.f32 %v128_v10, %v76_v58  ;;  %v145_v27 = vadd.f32 %v129_v11, %v77_v59  ;;  %v146_v28 = vadd.f32 %v130_v12, %v78_v60  ;;  %v147_v29 = vadd.f32 %v131_v13, %v79_v61 }
 0x1c9   :  { %v164_v30 = vcombine.low %v132_v14, %v133_v15  ;;  %v165_v32 = vcombine.low %v134_v16, %v135_v17  ;;  %v166_v31 = vcombine.low %v136_v18, %v137_v19  ;;  %v167_v33 = vcombine.low %v138_v20, %v139_v21 }
 0x1ca   :  { %v168_v34 = vcombine.low %v140_v22, %v141_v25  ;;  %v169_v35 = vcombine.low %v142_v23, %v143_v26  ;;  %v170_v36 = vcombine.low %v144_v24, %v145_v27  ;;  %v171_v37 = vcombine.low %v146_v28, %v147_v29 }
 0x1cb   :  { %180 = vst [vmem:[%s317_s3] sm:$0xff] %v164_v30  ;;  %181 = vst [vmem:[%s317_s3 + $0x8] sm:$0xff] %v165_v32 }
 0x1cc   :  { %182 = vst [vmem:[%s317_s3 + $0x10] sm:$0xff] %v166_v31  ;;  %183 = vst [vmem:[%s317_s3 + $0x18] sm:$0xff] %v167_v33 }
 0x1cd   :  { %184 = vst [vmem:[%s317_s3 + $0x20] sm:$0xff] %v168_v34  ;;  %185 = vst [vmem:[%s317_s3 + $0x28] sm:$0xff] %v169_v35 }
 0x1ce   :  { %186 = vst [vmem:[%s317_s3 + $0x30] sm:$0xff] %v170_v36  ;;  %187 = vst [vmem:[%s317_s3 + $0x38] sm:$0xff] %v171_v37 }

</bundles_post_ra>
